<compile_context>
chip_gen: v7x
topology: tpu7x:2x2x1
jax: 0.10.0
libtpu: 0.0.40
codegen_flags: <defaults>
</compile_context>

<pallas_src>
import jax
import jax.numpy as jnp
from jax.experimental import pallas as pl
from jax.experimental.pallas import tpu as pltpu

# ----------------------------- model config -----------------------------
B, S, D, H, V = 2, 8, 128, 4, 256          # batch, seq, hidden, heads, vocab
DH = D // H                                 # head dim
MLP = 4 * D
M = B * S                                   # total tokens


# ----------------------------- fused kernel -----------------------------
def _stage1_fused_kernel(ids_ref, labels_ref, bias_ref,
                         wte_ref, wpe_ref,
                         ln1_g_ref, ln1_b_ref,
                         w_qkv_ref, b_qkv_ref,
                         w_o_ref, b_o_ref,
                         ln2_g_ref, ln2_b_ref,
                         w_fc_ref, b_fc_ref,
                         w_pr_ref, b_pr_ref,
                         lnf_g_ref, lnf_b_ref,
                         w_lm_ref, b_lm_ref,
                         logits_ref, loss_ref):
    f32 = jnp.float32

    # ---- token + positional embedding (one-hot matmul keeps it on the MXU) --
    ids = ids_ref[...]                                              # (M,1) i32
    col_v = jax.lax.broadcasted_iota(jnp.int32, (M, V), 1)
    tok_onehot = (col_v == ids).astype(f32)                         # (M,V)
    h = jnp.dot(tok_onehot, wte_ref[...],
                preferred_element_type=f32) + wpe_ref[...]          # (M,D)

    def layer_norm(x, g, b):
        mu = jnp.mean(x, axis=-1, keepdims=True)
        var = jnp.mean((x - mu) ** 2, axis=-1, keepdims=True)
        return (x - mu) * jax.lax.rsqrt(var + 1e-5) * g + b

    # ---- attention block (LN -> QKV -> MHA -> proj, residual fused) --------
    hn = layer_norm(h, ln1_g_ref[...], ln1_b_ref[...])
    qkv = jnp.dot(hn, w_qkv_ref[...],
                  preferred_element_type=f32) + b_qkv_ref[...]      # (M,3D)
    q = qkv[:, 0 * D:1 * D]                                         # (M,D)
    k = qkv[:, 1 * D:2 * D]
    v = qkv[:, 2 * D:3 * D]

    bias = bias_ref[...]                                            # (B,S,S)
    scale = 1.0 / (DH ** 0.5)
    head_outs = []
    for hh in range(H):                                             # static unroll
        lo = hh * DH
        qh = q[:, lo:lo + DH].reshape(B, S, DH)
        kh = k[:, lo:lo + DH].reshape(B, S, DH)
        vh = v[:, lo:lo + DH].reshape(B, S, DH)
        # batched matmul (no explicit k.T transpose)
        s = jnp.einsum('bqd,bkd->bqk', qh, kh,
                       preferred_element_type=f32) * scale + bias   # (B,S,S)
        mx = jnp.max(s, axis=-1, keepdims=True)
        p = jnp.exp(s - mx)
        p = p / jnp.sum(p, axis=-1, keepdims=True)
        oh = jnp.einsum('bqk,bkd->bqd', p, vh,
                        preferred_element_type=f32)                 # (B,S,DH)
        head_outs.append(oh.reshape(M, DH))
    attn = jnp.concatenate(head_outs, axis=-1)                      # (M,D) lane-dense

    h = h + jnp.dot(attn, w_o_ref[...],
                    preferred_element_type=f32) + b_o_ref[...]      # fused residual

    # ---- MLP block (residual fused) ----------------------------------------
    hn = layer_norm(h, ln2_g_ref[...], ln2_b_ref[...])
    ff = jax.nn.gelu(jnp.dot(hn, w_fc_ref[...],
                             preferred_element_type=f32) + b_fc_ref[...],
                     approximate=True)
    h = h + jnp.dot(ff, w_pr_ref[...],
                    preferred_element_type=f32) + b_pr_ref[...]

    # ---- LM head ------------------------------------------------------------
    hn = layer_norm(h, lnf_g_ref[...], lnf_b_ref[...])
    logits = jnp.dot(hn, w_lm_ref[...],
                     preferred_element_type=f32) + b_lm_ref[...]    # (M,V)
    logits_ref[...] = logits.astype(logits_ref.dtype)

    # ---- shifted cross-entropy (labels pre-shifted; -1 = ignore) ------------
    labels = labels_ref[...]                                        # (M,1) i32
    mx = jnp.max(logits, axis=-1, keepdims=True)
    lse = jnp.log(jnp.sum(jnp.exp(logits - mx), axis=-1, keepdims=True)) + mx
    lbl_onehot = (col_v == labels).astype(f32)
    lbl_logit = jnp.sum(logits * lbl_onehot, axis=-1, keepdims=True)
    valid = (labels >= 0).astype(f32)
    loss = jnp.sum((lse - lbl_logit) * valid) / jnp.maximum(jnp.sum(valid), 1.0)
    # lane-dense scalar output (broadcast across 128 lanes)
    loss_ref[...] = jnp.full(loss_ref.shape, loss, loss_ref.dtype)


def _full_spec(arr):
    nd = arr.ndim
    return pl.BlockSpec(arr.shape, lambda i, _nd=nd: (0,) * _nd)


def _stage1_pallas(ids_2d, labels_2d, attn_bias, params, wpe_tiled):
    inputs = (
        ids_2d, labels_2d, attn_bias,
        params["wte"], wpe_tiled,
        params["ln1_g"], params["ln1_b"],
        params["w_qkv"], params["b_qkv"],
        params["w_o"], params["b_o"],
        params["ln2_g"], params["ln2_b"],
        params["w_fc"], params["b_fc"],
        params["w_pr"], params["b_pr"],
        params["lnf_g"], params["lnf_b"],
        params["w_lm"], params["b_lm"],
    )
    logits_flat, loss_pad = pl.pallas_call(
        _stage1_fused_kernel,
        out_shape=(jax.ShapeDtypeStruct((M, V), jnp.float32),
                   jax.ShapeDtypeStruct((1, 128), jnp.float32)),
        grid=(1,),
        in_specs=[_full_spec(a) for a in inputs],
        out_specs=(pl.BlockSpec((M, V), lambda i: (0, 0)),
                   pl.BlockSpec((1, 128), lambda i: (0, 0))),
        compiler_params=pltpu.CompilerParams(
            dimension_semantics=("arbitrary",)),
    )(*inputs)
    return logits_flat, loss_pad[0, 0]


# ----------------------------- parameters -------------------------------
def init_params(key):
    ks = jax.random.split(key, 8)
    n = lambda k, shape: (0.02 * jax.random.normal(k, shape)).astype(jnp.float32)
    ones = lambda shape: jnp.ones(shape, jnp.float32)
    zeros = lambda shape: jnp.zeros(shape, jnp.float32)
    return {
        "wte": n(ks[0], (V, D)),
        "wpe": n(ks[1], (S, D)),
        "ln1_g": ones((1, D)), "ln1_b": zeros((1, D)),
        "w_qkv": n(ks[2], (D, 3 * D)), "b_qkv": zeros((1, 3 * D)),
        "w_o": n(ks[3], (D, D)), "b_o": zeros((1, D)),
        "ln2_g": ones((1, D)), "ln2_b": zeros((1, D)),
        "w_fc": n(ks[4], (D, MLP)), "b_fc": zeros((1, MLP)),
        "w_pr": n(ks[5], (MLP, D)), "b_pr": zeros((1, D)),
        "lnf_g": ones((1, D)), "lnf_b": zeros((1, D)),
        "w_lm": n(ks[6], (D, V)), "b_lm": zeros((1, V)),
    }


# ----------------------------- forward (Stage1) --------------------------
def stage1_forward(params, x, attention_mask=None, labels=None):
    """x: (B, S) int32 token ids.  Returns (logits (B,S,V), loss or None)."""
    if attention_mask is None:
        attention_mask = jnp.ones((B, S), jnp.float32)
    attention_mask = attention_mask.astype(jnp.float32)

    NEG = jnp.float32(-1e9)
    causal = jnp.tril(jnp.ones((S, S), jnp.float32))                 # 1 where col<=row
    attn_bias = ((1.0 - causal)[None, :, :] * NEG
                 + (1.0 - attention_mask)[:, None, :] * NEG)         # (B,S,S)

    ids_2d = x.reshape(M, 1).astype(jnp.int32)
    if labels is not None:
        lab = labels.astype(jnp.int32)
        # HF-style causal shift: position t predicts token t+1; last pos ignored.
        shifted = jnp.concatenate(
            [lab[:, 1:], jnp.full((B, 1), -1, jnp.int32)], axis=1)
        labels_2d = shifted.reshape(M, 1)
    else:
        labels_2d = jnp.full((M, 1), -1, jnp.int32)

    wpe_tiled = jnp.tile(params["wpe"], (B, 1))                      # (M,D)

    logits_flat, loss = _stage1_pallas(ids_2d, labels_2d, attn_bias,
                                       params, wpe_tiled)
    logits = logits_flat.reshape(B, S, V)
    return logits, (loss if labels is not None else None)


# ----------------------------- main --------------------------------------
if __name__ == "__main__":
    key = jax.random.PRNGKey(0)
    pkey, xkey = jax.random.split(key)
    params = init_params(pkey)

    x = jax.random.randint(xkey, (B, S), 0, V, dtype=jnp.int32)
    attention_mask = jnp.ones((B, S), jnp.float32)
    labels = x  # standard LM objective

    fwd = jax.jit(stage1_forward)
    logits, loss = fwd(params, x, attention_mask, labels)
    jax.block_until_ready(logits)
    jax.block_until_ready(loss)

    assert logits.shape == (B, S, V)
    assert bool(jnp.isfinite(loss))
    print("KERNEL_OK")
</pallas_src>

<mosaic_0001>
module attributes {stable_mosaic.version = 11 : i64} {
  func.func @_stage1_fused_kernel(%arg0: i32, %arg1: memref<16x1xi32, #tpu.memory_space<vmem>>, %arg2: memref<16x1xi32, #tpu.memory_space<vmem>>, %arg3: memref<2x8x8xf32, #tpu.memory_space<vmem>>, %arg4: memref<256x128xf32, #tpu.memory_space<vmem>>, %arg5: memref<16x128xf32, #tpu.memory_space<vmem>>, %arg6: memref<1x128xf32, #tpu.memory_space<vmem>>, %arg7: memref<1x128xf32, #tpu.memory_space<vmem>>, %arg8: memref<128x384xf32, #tpu.memory_space<vmem>>, %arg9: memref<1x384xf32, #tpu.memory_space<vmem>>, %arg10: memref<128x128xf32, #tpu.memory_space<vmem>>, %arg11: memref<1x128xf32, #tpu.memory_space<vmem>>, %arg12: memref<1x128xf32, #tpu.memory_space<vmem>>, %arg13: memref<1x128xf32, #tpu.memory_space<vmem>>, %arg14: memref<128x512xf32, #tpu.memory_space<vmem>>, %arg15: memref<1x512xf32, #tpu.memory_space<vmem>>, %arg16: memref<512x128xf32, #tpu.memory_space<vmem>>, %arg17: memref<1x128xf32, #tpu.memory_space<vmem>>, %arg18: memref<1x128xf32, #tpu.memory_space<vmem>>, %arg19: memref<1x128xf32, #tpu.memory_space<vmem>>, %arg20: memref<128x256xf32, #tpu.memory_space<vmem>>, %arg21: memref<1x256xf32, #tpu.memory_space<vmem>>, %arg22: memref<16x256xf32, #tpu.memory_space<vmem>>, %arg23: memref<1x128xf32, #tpu.memory_space<vmem>>) attributes {dimension_semantics = [#tpu.dimension_semantics<arbitrary>], iteration_bounds = array<i64: 1>, scalar_prefetch = 0 : i64, scratch_operands = 0 : i64, tpu.core_type = #tpu.core_type<tc>, window_params = [{pipeline_mode = #tpu.pipeline_mode<synchronous>, transform_indices = @transform_0, window_bounds = array<i64: 16, 1>}, {pipeline_mode = #tpu.pipeline_mode<synchronous>, transform_indices = @transform_1, window_bounds = array<i64: 16, 1>}, {pipeline_mode = #tpu.pipeline_mode<synchronous>, transform_indices = @transform_2, window_bounds = array<i64: 2, 8, 8>}, {pipeline_mode = #tpu.pipeline_mode<synchronous>, transform_indices = @transform_3, window_bounds = array<i64: 256, 128>}, {pipeline_mode = #tpu.pipeline_mode<synchronous>, transform_indices = @transform_4, window_bounds = array<i64: 16, 128>}, {pipeline_mode = #tpu.pipeline_mode<synchronous>, transform_indices = @transform_5, window_bounds = array<i64: 1, 128>}, {pipeline_mode = #tpu.pipeline_mode<synchronous>, transform_indices = @transform_6, window_bounds = array<i64: 1, 128>}, {pipeline_mode = #tpu.pipeline_mode<synchronous>, transform_indices = @transform_7, window_bounds = array<i64: 128, 384>}, {pipeline_mode = #tpu.pipeline_mode<synchronous>, transform_indices = @transform_8, window_bounds = array<i64: 1, 384>}, {pipeline_mode = #tpu.pipeline_mode<synchronous>, transform_indices = @transform_9, window_bounds = array<i64: 128, 128>}, {pipeline_mode = #tpu.pipeline_mode<synchronous>, transform_indices = @transform_10, window_bounds = array<i64: 1, 128>}, {pipeline_mode = #tpu.pipeline_mode<synchronous>, transform_indices = @transform_11, window_bounds = array<i64: 1, 128>}, {pipeline_mode = #tpu.pipeline_mode<synchronous>, transform_indices = @transform_12, window_bounds = array<i64: 1, 128>}, {pipeline_mode = #tpu.pipeline_mode<synchronous>, transform_indices = @transform_13, window_bounds = array<i64: 128, 512>}, {pipeline_mode = #tpu.pipeline_mode<synchronous>, transform_indices = @transform_14, window_bounds = array<i64: 1, 512>}, {pipeline_mode = #tpu.pipeline_mode<synchronous>, transform_indices = @transform_15, window_bounds = array<i64: 512, 128>}, {pipeline_mode = #tpu.pipeline_mode<synchronous>, transform_indices = @transform_16, window_bounds = array<i64: 1, 128>}, {pipeline_mode = #tpu.pipeline_mode<synchronous>, transform_indices = @transform_17, window_bounds = array<i64: 1, 128>}, {pipeline_mode = #tpu.pipeline_mode<synchronous>, transform_indices = @transform_18, window_bounds = array<i64: 1, 128>}, {pipeline_mode = #tpu.pipeline_mode<synchronous>, transform_indices = @transform_19, window_bounds = array<i64: 128, 256>}, {pipeline_mode = #tpu.pipeline_mode<synchronous>, transform_indices = @transform_20, window_bounds = array<i64: 1, 256>}, {pipeline_mode = #tpu.pipeline_mode<synchronous>, transform_indices = @transform_21, window_bounds = array<i64: 16, 256>}, {pipeline_mode = #tpu.pipeline_mode<synchronous>, transform_indices = @transform_22, window_bounds = array<i64: 1, 128>}]} {
    %c0 = arith.constant 0 : index
    %c0_0 = arith.constant 0 : index
    %0 = vector.load %arg1[%c0, %c0_0] : memref<16x1xi32, #tpu.memory_space<vmem>>, vector<16x1xi32>
    %1 = tpu.iota {dimensions = array<i32: 1>} : vector<16x256xi32>
    %2 = vector.broadcast %0 : vector<16x1xi32> to vector<16x256xi32>
    %3 = arith.cmpi eq, %1, %2 : vector<16x256xi32>
    %4 = arith.extui %3 : vector<16x256xi1> to vector<16x256xi32>
    %5 = arith.sitofp %4 : vector<16x256xi32> to vector<16x256xf32>
    %c0_1 = arith.constant 0 : index
    %c0_2 = arith.constant 0 : index
    %6 = vector.load %arg4[%c0_1, %c0_2] : memref<256x128xf32, #tpu.memory_space<vmem>>, vector<256x128xf32>
    %cst = arith.constant dense<0.000000e+00> : vector<16x128xf32>
    %7 = tpu.matmul %5, %6, %cst {dimension_numbers = #tpu.dot_dimension_numbers<[1], [0], [0], [1], [0, 0, 1, 1], [], []>} : vector<16x256xf32>, vector<256x128xf32>, vector<16x128xf32> -> vector<16x128xf32>
    %c0_3 = arith.constant 0 : index
    %c0_4 = arith.constant 0 : index
    %8 = vector.load %arg5[%c0_3, %c0_4] : memref<16x128xf32, #tpu.memory_space<vmem>>, vector<16x128xf32>
    %9 = arith.addf %7, %8 : vector<16x128xf32>
    %c0_5 = arith.constant 0 : index
    %c0_6 = arith.constant 0 : index
    %10 = vector.load %arg6[%c0_5, %c0_6] : memref<1x128xf32, #tpu.memory_space<vmem>>, vector<1x128xf32>
    %c0_7 = arith.constant 0 : index
    %c0_8 = arith.constant 0 : index
    %11 = vector.load %arg7[%c0_7, %c0_8] : memref<1x128xf32, #tpu.memory_space<vmem>>, vector<1x128xf32>
    %cst_9 = arith.constant dense<0.000000e+00> : vector<16xf32>
    %12 = vector.multi_reduction <add>, %9, %cst_9 [1] : vector<16x128xf32> to vector<16xf32>
    %13 = vector.shape_cast %12 : vector<16xf32> to vector<16x1xf32>
    %cst_10 = arith.constant 1.280000e+02 : f32
    %14 = vector.broadcast %cst_10 : f32 to vector<16x1xf32>
    %15 = arith.divf %13, %14 : vector<16x1xf32>
    %16 = vector.broadcast %15 : vector<16x1xf32> to vector<16x128xf32>
    %17 = arith.subf %9, %16 : vector<16x128xf32>
    %18 = arith.mulf %17, %17 : vector<16x128xf32>
    %cst_11 = arith.constant dense<0.000000e+00> : vector<16xf32>
    %19 = vector.multi_reduction <add>, %18, %cst_11 [1] : vector<16x128xf32> to vector<16xf32>
    %20 = vector.shape_cast %19 : vector<16xf32> to vector<16x1xf32>
    %cst_12 = arith.constant 1.280000e+02 : f32
    %21 = vector.broadcast %cst_12 : f32 to vector<16x1xf32>
    %22 = arith.divf %20, %21 : vector<16x1xf32>
    %23 = vector.broadcast %15 : vector<16x1xf32> to vector<16x128xf32>
    %24 = arith.subf %9, %23 : vector<16x128xf32>
    %cst_13 = arith.constant 9.99999974E-6 : f32
    %25 = vector.broadcast %cst_13 : f32 to vector<16x1xf32>
    %26 = arith.addf %22, %25 : vector<16x1xf32>
    %27 = math.rsqrt %26 : vector<16x1xf32>
    %28 = vector.broadcast %27 : vector<16x1xf32> to vector<16x128xf32>
    %29 = arith.mulf %24, %28 : vector<16x128xf32>
    %30 = vector.broadcast %10 : vector<1x128xf32> to vector<16x128xf32>
    %31 = arith.mulf %29, %30 : vector<16x128xf32>
    %32 = vector.broadcast %11 : vector<1x128xf32> to vector<16x128xf32>
    %33 = arith.addf %31, %32 : vector<16x128xf32>
    %c0_14 = arith.constant 0 : index
    %c0_15 = arith.constant 0 : index
    %34 = vector.load %arg8[%c0_14, %c0_15] : memref<128x384xf32, #tpu.memory_space<vmem>>, vector<128x384xf32>
    %cst_16 = arith.constant dense<0.000000e+00> : vector<16x384xf32>
    %35 = tpu.matmul %33, %34, %cst_16 {dimension_numbers = #tpu.dot_dimension_numbers<[1], [0], [0], [1], [0, 0, 1, 1], [], []>} : vector<16x128xf32>, vector<128x384xf32>, vector<16x384xf32> -> vector<16x384xf32>
    %c0_17 = arith.constant 0 : index
    %c0_18 = arith.constant 0 : index
    %36 = vector.load %arg9[%c0_17, %c0_18] : memref<1x384xf32, #tpu.memory_space<vmem>>, vector<1x384xf32>
    %37 = vector.broadcast %36 : vector<1x384xf32> to vector<16x384xf32>
    %38 = arith.addf %35, %37 : vector<16x384xf32>
    %39 = vector.extract_strided_slice %38 {offsets = [0, 0], sizes = [16, 128], strides = [1, 1]} : vector<16x384xf32> to vector<16x128xf32>
    %40 = vector.extract_strided_slice %38 {offsets = [0, 128], sizes = [16, 128], strides = [1, 1]} : vector<16x384xf32> to vector<16x128xf32>
    %41 = vector.extract_strided_slice %38 {offsets = [0, 256], sizes = [16, 128], strides = [1, 1]} : vector<16x384xf32> to vector<16x128xf32>
    %c0_19 = arith.constant 0 : index
    %c0_20 = arith.constant 0 : index
    %c0_21 = arith.constant 0 : index
    %42 = vector.load %arg3[%c0_19, %c0_20, %c0_21] : memref<2x8x8xf32, #tpu.memory_space<vmem>>, vector<2x8x8xf32>
    %43 = vector.extract_strided_slice %39 {offsets = [0, 0], sizes = [16, 32], strides = [1, 1]} : vector<16x128xf32> to vector<16x32xf32>
    %44 = vector.shape_cast %43 : vector<16x32xf32> to vector<2x8x32xf32>
    %45 = vector.extract_strided_slice %40 {offsets = [0, 0], sizes = [16, 32], strides = [1, 1]} : vector<16x128xf32> to vector<16x32xf32>
    %46 = vector.shape_cast %45 : vector<16x32xf32> to vector<2x8x32xf32>
    %47 = vector.extract_strided_slice %41 {offsets = [0, 0], sizes = [16, 32], strides = [1, 1]} : vector<16x128xf32> to vector<16x32xf32>
    %48 = vector.shape_cast %47 : vector<16x32xf32> to vector<2x8x32xf32>
    "tpu.trace_start"() <{level = 10 : i32, message = "bqd,bkd->bqk"}> : () -> ()
    %cst_22 = arith.constant dense<0.000000e+00> : vector<2x8x8xf32>
    %49 = tpu.matmul %44, %46, %cst_22 {dimension_numbers = #tpu.dot_dimension_numbers<[2], [2], [1], [1], [0, 0, 0, 1, 1, 1], [0], [0]>} : vector<2x8x32xf32>, vector<2x8x32xf32>, vector<2x8x8xf32> -> vector<2x8x8xf32>
    "tpu.trace_stop"() : () -> ()
    %cst_23 = arith.constant 0.176776692 : f32
    %50 = vector.broadcast %cst_23 : f32 to vector<2x8x8xf32>
    %51 = arith.mulf %49, %50 : vector<2x8x8xf32>
    %52 = arith.addf %51, %42 : vector<2x8x8xf32>
    %cst_24 = arith.constant dense<0xFF800000> : vector<2x8xf32>
    %53 = vector.multi_reduction <maximumf>, %52, %cst_24 [2] : vector<2x8x8xf32> to vector<2x8xf32>
    %54 = vector.shape_cast %53 : vector<2x8xf32> to vector<2x8x1xf32>
    %55 = vector.broadcast %54 : vector<2x8x1xf32> to vector<2x8x8xf32>
    %56 = arith.subf %52, %55 : vector<2x8x8xf32>
    %57 = math.exp %56 : vector<2x8x8xf32>
    %cst_25 = arith.constant dense<0.000000e+00> : vector<2x8xf32>
    %58 = vector.multi_reduction <add>, %57, %cst_25 [2] : vector<2x8x8xf32> to vector<2x8xf32>
    %59 = vector.shape_cast %58 : vector<2x8xf32> to vector<2x8x1xf32>
    %60 = vector.broadcast %59 : vector<2x8x1xf32> to vector<2x8x8xf32>
    %61 = arith.divf %57, %60 : vector<2x8x8xf32>
    "tpu.trace_start"() <{level = 10 : i32, message = "bqk,bkd->bqd"}> : () -> ()
    %cst_26 = arith.constant dense<0.000000e+00> : vector<2x8x32xf32>
    %62 = tpu.matmul %61, %48, %cst_26 {dimension_numbers = #tpu.dot_dimension_numbers<[2], [1], [1], [2], [0, 0, 0, 1, 1, 2], [0], [0]>} : vector<2x8x8xf32>, vector<2x8x32xf32>, vector<2x8x32xf32> -> vector<2x8x32xf32>
    "tpu.trace_stop"() : () -> ()
    %63 = vector.shape_cast %62 : vector<2x8x32xf32> to vector<16x32xf32>
    %64 = vector.extract_strided_slice %39 {offsets = [0, 32], sizes = [16, 32], strides = [1, 1]} : vector<16x128xf32> to vector<16x32xf32>
    %65 = vector.shape_cast %64 : vector<16x32xf32> to vector<2x8x32xf32>
    %66 = vector.extract_strided_slice %40 {offsets = [0, 32], sizes = [16, 32], strides = [1, 1]} : vector<16x128xf32> to vector<16x32xf32>
    %67 = vector.shape_cast %66 : vector<16x32xf32> to vector<2x8x32xf32>
    %68 = vector.extract_strided_slice %41 {offsets = [0, 32], sizes = [16, 32], strides = [1, 1]} : vector<16x128xf32> to vector<16x32xf32>
    %69 = vector.shape_cast %68 : vector<16x32xf32> to vector<2x8x32xf32>
    "tpu.trace_start"() <{level = 10 : i32, message = "bqd,bkd->bqk"}> : () -> ()
    %cst_27 = arith.constant dense<0.000000e+00> : vector<2x8x8xf32>
    %70 = tpu.matmul %65, %67, %cst_27 {dimension_numbers = #tpu.dot_dimension_numbers<[2], [2], [1], [1], [0, 0, 0, 1, 1, 1], [0], [0]>} : vector<2x8x32xf32>, vector<2x8x32xf32>, vector<2x8x8xf32> -> vector<2x8x8xf32>
    "tpu.trace_stop"() : () -> ()
    %cst_28 = arith.constant 0.176776692 : f32
    %71 = vector.broadcast %cst_28 : f32 to vector<2x8x8xf32>
    %72 = arith.mulf %70, %71 : vector<2x8x8xf32>
    %73 = arith.addf %72, %42 : vector<2x8x8xf32>
    %cst_29 = arith.constant dense<0xFF800000> : vector<2x8xf32>
    %74 = vector.multi_reduction <maximumf>, %73, %cst_29 [2] : vector<2x8x8xf32> to vector<2x8xf32>
    %75 = vector.shape_cast %74 : vector<2x8xf32> to vector<2x8x1xf32>
    %76 = vector.broadcast %75 : vector<2x8x1xf32> to vector<2x8x8xf32>
    %77 = arith.subf %73, %76 : vector<2x8x8xf32>
    %78 = math.exp %77 : vector<2x8x8xf32>
    %cst_30 = arith.constant dense<0.000000e+00> : vector<2x8xf32>
    %79 = vector.multi_reduction <add>, %78, %cst_30 [2] : vector<2x8x8xf32> to vector<2x8xf32>
    %80 = vector.shape_cast %79 : vector<2x8xf32> to vector<2x8x1xf32>
    %81 = vector.broadcast %80 : vector<2x8x1xf32> to vector<2x8x8xf32>
    %82 = arith.divf %78, %81 : vector<2x8x8xf32>
    "tpu.trace_start"() <{level = 10 : i32, message = "bqk,bkd->bqd"}> : () -> ()
    %cst_31 = arith.constant dense<0.000000e+00> : vector<2x8x32xf32>
    %83 = tpu.matmul %82, %69, %cst_31 {dimension_numbers = #tpu.dot_dimension_numbers<[2], [1], [1], [2], [0, 0, 0, 1, 1, 2], [0], [0]>} : vector<2x8x8xf32>, vector<2x8x32xf32>, vector<2x8x32xf32> -> vector<2x8x32xf32>
    "tpu.trace_stop"() : () -> ()
    %84 = vector.shape_cast %83 : vector<2x8x32xf32> to vector<16x32xf32>
    %85 = vector.extract_strided_slice %39 {offsets = [0, 64], sizes = [16, 32], strides = [1, 1]} : vector<16x128xf32> to vector<16x32xf32>
    %86 = vector.shape_cast %85 : vector<16x32xf32> to vector<2x8x32xf32>
    %87 = vector.extract_strided_slice %40 {offsets = [0, 64], sizes = [16, 32], strides = [1, 1]} : vector<16x128xf32> to vector<16x32xf32>
    %88 = vector.shape_cast %87 : vector<16x32xf32> to vector<2x8x32xf32>
    %89 = vector.extract_strided_slice %41 {offsets = [0, 64], sizes = [16, 32], strides = [1, 1]} : vector<16x128xf32> to vector<16x32xf32>
    %90 = vector.shape_cast %89 : vector<16x32xf32> to vector<2x8x32xf32>
    "tpu.trace_start"() <{level = 10 : i32, message = "bqd,bkd->bqk"}> : () -> ()
    %cst_32 = arith.constant dense<0.000000e+00> : vector<2x8x8xf32>
    %91 = tpu.matmul %86, %88, %cst_32 {dimension_numbers = #tpu.dot_dimension_numbers<[2], [2], [1], [1], [0, 0, 0, 1, 1, 1], [0], [0]>} : vector<2x8x32xf32>, vector<2x8x32xf32>, vector<2x8x8xf32> -> vector<2x8x8xf32>
    "tpu.trace_stop"() : () -> ()
    %cst_33 = arith.constant 0.176776692 : f32
    %92 = vector.broadcast %cst_33 : f32 to vector<2x8x8xf32>
    %93 = arith.mulf %91, %92 : vector<2x8x8xf32>
    %94 = arith.addf %93, %42 : vector<2x8x8xf32>
    %cst_34 = arith.constant dense<0xFF800000> : vector<2x8xf32>
    %95 = vector.multi_reduction <maximumf>, %94, %cst_34 [2] : vector<2x8x8xf32> to vector<2x8xf32>
    %96 = vector.shape_cast %95 : vector<2x8xf32> to vector<2x8x1xf32>
    %97 = vector.broadcast %96 : vector<2x8x1xf32> to vector<2x8x8xf32>
    %98 = arith.subf %94, %97 : vector<2x8x8xf32>
    %99 = math.exp %98 : vector<2x8x8xf32>
    %cst_35 = arith.constant dense<0.000000e+00> : vector<2x8xf32>
    %100 = vector.multi_reduction <add>, %99, %cst_35 [2] : vector<2x8x8xf32> to vector<2x8xf32>
    %101 = vector.shape_cast %100 : vector<2x8xf32> to vector<2x8x1xf32>
    %102 = vector.broadcast %101 : vector<2x8x1xf32> to vector<2x8x8xf32>
    %103 = arith.divf %99, %102 : vector<2x8x8xf32>
    "tpu.trace_start"() <{level = 10 : i32, message = "bqk,bkd->bqd"}> : () -> ()
    %cst_36 = arith.constant dense<0.000000e+00> : vector<2x8x32xf32>
    %104 = tpu.matmul %103, %90, %cst_36 {dimension_numbers = #tpu.dot_dimension_numbers<[2], [1], [1], [2], [0, 0, 0, 1, 1, 2], [0], [0]>} : vector<2x8x8xf32>, vector<2x8x32xf32>, vector<2x8x32xf32> -> vector<2x8x32xf32>
    "tpu.trace_stop"() : () -> ()
    %105 = vector.shape_cast %104 : vector<2x8x32xf32> to vector<16x32xf32>
    %106 = vector.extract_strided_slice %39 {offsets = [0, 96], sizes = [16, 32], strides = [1, 1]} : vector<16x128xf32> to vector<16x32xf32>
    %107 = vector.shape_cast %106 : vector<16x32xf32> to vector<2x8x32xf32>
    %108 = vector.extract_strided_slice %40 {offsets = [0, 96], sizes = [16, 32], strides = [1, 1]} : vector<16x128xf32> to vector<16x32xf32>
    %109 = vector.shape_cast %108 : vector<16x32xf32> to vector<2x8x32xf32>
    %110 = vector.extract_strided_slice %41 {offsets = [0, 96], sizes = [16, 32], strides = [1, 1]} : vector<16x128xf32> to vector<16x32xf32>
    %111 = vector.shape_cast %110 : vector<16x32xf32> to vector<2x8x32xf32>
    "tpu.trace_start"() <{level = 10 : i32, message = "bqd,bkd->bqk"}> : () -> ()
    %cst_37 = arith.constant dense<0.000000e+00> : vector<2x8x8xf32>
    %112 = tpu.matmul %107, %109, %cst_37 {dimension_numbers = #tpu.dot_dimension_numbers<[2], [2], [1], [1], [0, 0, 0, 1, 1, 1], [0], [0]>} : vector<2x8x32xf32>, vector<2x8x32xf32>, vector<2x8x8xf32> -> vector<2x8x8xf32>
    "tpu.trace_stop"() : () -> ()
    %cst_38 = arith.constant 0.176776692 : f32
    %113 = vector.broadcast %cst_38 : f32 to vector<2x8x8xf32>
    %114 = arith.mulf %112, %113 : vector<2x8x8xf32>
    %115 = arith.addf %114, %42 : vector<2x8x8xf32>
    %cst_39 = arith.constant dense<0xFF800000> : vector<2x8xf32>
    %116 = vector.multi_reduction <maximumf>, %115, %cst_39 [2] : vector<2x8x8xf32> to vector<2x8xf32>
    %117 = vector.shape_cast %116 : vector<2x8xf32> to vector<2x8x1xf32>
    %118 = vector.broadcast %117 : vector<2x8x1xf32> to vector<2x8x8xf32>
    %119 = arith.subf %115, %118 : vector<2x8x8xf32>
    %120 = math.exp %119 : vector<2x8x8xf32>
    %cst_40 = arith.constant dense<0.000000e+00> : vector<2x8xf32>
    %121 = vector.multi_reduction <add>, %120, %cst_40 [2] : vector<2x8x8xf32> to vector<2x8xf32>
    %122 = vector.shape_cast %121 : vector<2x8xf32> to vector<2x8x1xf32>
    %123 = vector.broadcast %122 : vector<2x8x1xf32> to vector<2x8x8xf32>
    %124 = arith.divf %120, %123 : vector<2x8x8xf32>
    "tpu.trace_start"() <{level = 10 : i32, message = "bqk,bkd->bqd"}> : () -> ()
    %cst_41 = arith.constant dense<0.000000e+00> : vector<2x8x32xf32>
    %125 = tpu.matmul %124, %111, %cst_41 {dimension_numbers = #tpu.dot_dimension_numbers<[2], [1], [1], [2], [0, 0, 0, 1, 1, 2], [0], [0]>} : vector<2x8x8xf32>, vector<2x8x32xf32>, vector<2x8x32xf32> -> vector<2x8x32xf32>
    "tpu.trace_stop"() : () -> ()
    %126 = vector.shape_cast %125 : vector<2x8x32xf32> to vector<16x32xf32>
    %127 = tpu.concatenate %63, %84, %105, %126 in 1 : vector<16x32xf32>, vector<16x32xf32>, vector<16x32xf32>, vector<16x32xf32> -> vector<16x128xf32>
    %c0_42 = arith.constant 0 : index
    %c0_43 = arith.constant 0 : index
    %128 = vector.load %arg10[%c0_42, %c0_43] : memref<128x128xf32, #tpu.memory_space<vmem>>, vector<128x128xf32>
    %cst_44 = arith.constant dense<0.000000e+00> : vector<16x128xf32>
    %129 = tpu.matmul %127, %128, %cst_44 {dimension_numbers = #tpu.dot_dimension_numbers<[1], [0], [0], [1], [0, 0, 1, 1], [], []>} : vector<16x128xf32>, vector<128x128xf32>, vector<16x128xf32> -> vector<16x128xf32>
    %130 = arith.addf %9, %129 : vector<16x128xf32>
    %c0_45 = arith.constant 0 : index
    %c0_46 = arith.constant 0 : index
    %131 = vector.load %arg11[%c0_45, %c0_46] : memref<1x128xf32, #tpu.memory_space<vmem>>, vector<1x128xf32>
    %132 = vector.broadcast %131 : vector<1x128xf32> to vector<16x128xf32>
    %133 = arith.addf %130, %132 : vector<16x128xf32>
    %c0_47 = arith.constant 0 : index
    %c0_48 = arith.constant 0 : index
    %134 = vector.load %arg12[%c0_47, %c0_48] : memref<1x128xf32, #tpu.memory_space<vmem>>, vector<1x128xf32>
    %c0_49 = arith.constant 0 : index
    %c0_50 = arith.constant 0 : index
    %135 = vector.load %arg13[%c0_49, %c0_50] : memref<1x128xf32, #tpu.memory_space<vmem>>, vector<1x128xf32>
    %cst_51 = arith.constant dense<0.000000e+00> : vector<16xf32>
    %136 = vector.multi_reduction <add>, %133, %cst_51 [1] : vector<16x128xf32> to vector<16xf32>
    %137 = vector.shape_cast %136 : vector<16xf32> to vector<16x1xf32>
    %cst_52 = arith.constant 1.280000e+02 : f32
    %138 = vector.broadcast %cst_52 : f32 to vector<16x1xf32>
    %139 = arith.divf %137, %138 : vector<16x1xf32>
    %140 = vector.broadcast %139 : vector<16x1xf32> to vector<16x128xf32>
    %141 = arith.subf %133, %140 : vector<16x128xf32>
    %142 = arith.mulf %141, %141 : vector<16x128xf32>
    %cst_53 = arith.constant dense<0.000000e+00> : vector<16xf32>
    %143 = vector.multi_reduction <add>, %142, %cst_53 [1] : vector<16x128xf32> to vector<16xf32>
    %144 = vector.shape_cast %143 : vector<16xf32> to vector<16x1xf32>
    %cst_54 = arith.constant 1.280000e+02 : f32
    %145 = vector.broadcast %cst_54 : f32 to vector<16x1xf32>
    %146 = arith.divf %144, %145 : vector<16x1xf32>
    %147 = vector.broadcast %139 : vector<16x1xf32> to vector<16x128xf32>
    %148 = arith.subf %133, %147 : vector<16x128xf32>
    %cst_55 = arith.constant 9.99999974E-6 : f32
    %149 = vector.broadcast %cst_55 : f32 to vector<16x1xf32>
    %150 = arith.addf %146, %149 : vector<16x1xf32>
    %151 = math.rsqrt %150 : vector<16x1xf32>
    %152 = vector.broadcast %151 : vector<16x1xf32> to vector<16x128xf32>
    %153 = arith.mulf %148, %152 : vector<16x128xf32>
    %154 = vector.broadcast %134 : vector<1x128xf32> to vector<16x128xf32>
    %155 = arith.mulf %153, %154 : vector<16x128xf32>
    %156 = vector.broadcast %135 : vector<1x128xf32> to vector<16x128xf32>
    %157 = arith.addf %155, %156 : vector<16x128xf32>
    %c0_56 = arith.constant 0 : index
    %c0_57 = arith.constant 0 : index
    %158 = vector.load %arg14[%c0_56, %c0_57] : memref<128x512xf32, #tpu.memory_space<vmem>>, vector<128x512xf32>
    %cst_58 = arith.constant dense<0.000000e+00> : vector<16x512xf32>
    %159 = tpu.matmul %157, %158, %cst_58 {dimension_numbers = #tpu.dot_dimension_numbers<[1], [0], [0], [1], [0, 0, 1, 1], [], []>} : vector<16x128xf32>, vector<128x512xf32>, vector<16x512xf32> -> vector<16x512xf32>
    %c0_59 = arith.constant 0 : index
    %c0_60 = arith.constant 0 : index
    %160 = vector.load %arg15[%c0_59, %c0_60] : memref<1x512xf32, #tpu.memory_space<vmem>>, vector<1x512xf32>
    %161 = vector.broadcast %160 : vector<1x512xf32> to vector<16x512xf32>
    %162 = arith.addf %159, %161 : vector<16x512xf32>
    %163 = arith.mulf %162, %162 : vector<16x512xf32>
    %164 = arith.mulf %162, %163 : vector<16x512xf32>
    %cst_61 = arith.constant 4.471500e-02 : f32
    %165 = vector.broadcast %cst_61 : f32 to vector<16x512xf32>
    %166 = arith.mulf %165, %164 : vector<16x512xf32>
    %167 = arith.addf %162, %166 : vector<16x512xf32>
    %cst_62 = arith.constant 0.797884583 : f32
    %168 = vector.broadcast %cst_62 : f32 to vector<16x512xf32>
    %169 = arith.mulf %168, %167 : vector<16x512xf32>
    %170 = math.tanh %169 : vector<16x512xf32>
    %cst_63 = arith.constant 1.000000e+00 : f32
    %171 = vector.broadcast %cst_63 : f32 to vector<16x512xf32>
    %172 = arith.addf %171, %170 : vector<16x512xf32>
    %cst_64 = arith.constant 5.000000e-01 : f32
    %173 = vector.broadcast %cst_64 : f32 to vector<16x512xf32>
    %174 = arith.mulf %173, %172 : vector<16x512xf32>
    %175 = arith.mulf %162, %174 : vector<16x512xf32>
    %c0_65 = arith.constant 0 : index
    %c0_66 = arith.constant 0 : index
    %176 = vector.load %arg16[%c0_65, %c0_66] : memref<512x128xf32, #tpu.memory_space<vmem>>, vector<512x128xf32>
    %cst_67 = arith.constant dense<0.000000e+00> : vector<16x128xf32>
    %177 = tpu.matmul %175, %176, %cst_67 {dimension_numbers = #tpu.dot_dimension_numbers<[1], [0], [0], [1], [0, 0, 1, 1], [], []>} : vector<16x512xf32>, vector<512x128xf32>, vector<16x128xf32> -> vector<16x128xf32>
    %178 = arith.addf %133, %177 : vector<16x128xf32>
    %c0_68 = arith.constant 0 : index
    %c0_69 = arith.constant 0 : index
    %179 = vector.load %arg17[%c0_68, %c0_69] : memref<1x128xf32, #tpu.memory_space<vmem>>, vector<1x128xf32>
    %180 = vector.broadcast %179 : vector<1x128xf32> to vector<16x128xf32>
    %181 = arith.addf %178, %180 : vector<16x128xf32>
    %c0_70 = arith.constant 0 : index
    %c0_71 = arith.constant 0 : index
    %182 = vector.load %arg18[%c0_70, %c0_71] : memref<1x128xf32, #tpu.memory_space<vmem>>, vector<1x128xf32>
    %c0_72 = arith.constant 0 : index
    %c0_73 = arith.constant 0 : index
    %183 = vector.load %arg19[%c0_72, %c0_73] : memref<1x128xf32, #tpu.memory_space<vmem>>, vector<1x128xf32>
    %cst_74 = arith.constant dense<0.000000e+00> : vector<16xf32>
    %184 = vector.multi_reduction <add>, %181, %cst_74 [1] : vector<16x128xf32> to vector<16xf32>
    %185 = vector.shape_cast %184 : vector<16xf32> to vector<16x1xf32>
    %cst_75 = arith.constant 1.280000e+02 : f32
    %186 = vector.broadcast %cst_75 : f32 to vector<16x1xf32>
    %187 = arith.divf %185, %186 : vector<16x1xf32>
    %188 = vector.broadcast %187 : vector<16x1xf32> to vector<16x128xf32>
    %189 = arith.subf %181, %188 : vector<16x128xf32>
    %190 = arith.mulf %189, %189 : vector<16x128xf32>
    %cst_76 = arith.constant dense<0.000000e+00> : vector<16xf32>
    %191 = vector.multi_reduction <add>, %190, %cst_76 [1] : vector<16x128xf32> to vector<16xf32>
    %192 = vector.shape_cast %191 : vector<16xf32> to vector<16x1xf32>
    %cst_77 = arith.constant 1.280000e+02 : f32
    %193 = vector.broadcast %cst_77 : f32 to vector<16x1xf32>
    %194 = arith.divf %192, %193 : vector<16x1xf32>
    %195 = vector.broadcast %187 : vector<16x1xf32> to vector<16x128xf32>
    %196 = arith.subf %181, %195 : vector<16x128xf32>
    %cst_78 = arith.constant 9.99999974E-6 : f32
    %197 = vector.broadcast %cst_78 : f32 to vector<16x1xf32>
    %198 = arith.addf %194, %197 : vector<16x1xf32>
    %199 = math.rsqrt %198 : vector<16x1xf32>
    %200 = vector.broadcast %199 : vector<16x1xf32> to vector<16x128xf32>
    %201 = arith.mulf %196, %200 : vector<16x128xf32>
    %202 = vector.broadcast %182 : vector<1x128xf32> to vector<16x128xf32>
    %203 = arith.mulf %201, %202 : vector<16x128xf32>
    %204 = vector.broadcast %183 : vector<1x128xf32> to vector<16x128xf32>
    %205 = arith.addf %203, %204 : vector<16x128xf32>
    %c0_79 = arith.constant 0 : index
    %c0_80 = arith.constant 0 : index
    %206 = vector.load %arg20[%c0_79, %c0_80] : memref<128x256xf32, #tpu.memory_space<vmem>>, vector<128x256xf32>
    %cst_81 = arith.constant dense<0.000000e+00> : vector<16x256xf32>
    %207 = tpu.matmul %205, %206, %cst_81 {dimension_numbers = #tpu.dot_dimension_numbers<[1], [0], [0], [1], [0, 0, 1, 1], [], []>} : vector<16x128xf32>, vector<128x256xf32>, vector<16x256xf32> -> vector<16x256xf32>
    %c0_82 = arith.constant 0 : index
    %c0_83 = arith.constant 0 : index
    %208 = vector.load %arg21[%c0_82, %c0_83] : memref<1x256xf32, #tpu.memory_space<vmem>>, vector<1x256xf32>
    %209 = vector.broadcast %208 : vector<1x256xf32> to vector<16x256xf32>
    %210 = arith.addf %207, %209 : vector<16x256xf32>
    %c0_84 = arith.constant 0 : index
    %c0_85 = arith.constant 0 : index
    %211 = vector.load %arg22[%c0_84, %c0_85] : memref<16x256xf32, #tpu.memory_space<vmem>>, vector<16x256xf32>
    tpu.vector_store %arg22[%c0_84, %c0_85], %210 {strides = array<i32>} : memref<16x256xf32, #tpu.memory_space<vmem>>, vector<16x256xf32>,
    %c0_86 = arith.constant 0 : index
    %c0_87 = arith.constant 0 : index
    %212 = vector.load %arg2[%c0_86, %c0_87] : memref<16x1xi32, #tpu.memory_space<vmem>>, vector<16x1xi32>
    %cst_88 = arith.constant dense<0xFF800000> : vector<16xf32>
    %213 = vector.multi_reduction <maximumf>, %210, %cst_88 [1] : vector<16x256xf32> to vector<16xf32>
    %214 = vector.shape_cast %213 : vector<16xf32> to vector<16x1xf32>
    %215 = vector.broadcast %214 : vector<16x1xf32> to vector<16x256xf32>
    %216 = arith.subf %210, %215 : vector<16x256xf32>
    %217 = math.exp %216 : vector<16x256xf32>
    %cst_89 = arith.constant dense<0.000000e+00> : vector<16xf32>
    %218 = vector.multi_reduction <add>, %217, %cst_89 [1] : vector<16x256xf32> to vector<16xf32>
    %219 = vector.shape_cast %218 : vector<16xf32> to vector<16x1xf32>
    %220 = math.log %219 : vector<16x1xf32>
    %221 = arith.addf %220, %214 : vector<16x1xf32>
    %222 = vector.broadcast %212 : vector<16x1xi32> to vector<16x256xi32>
    %223 = arith.cmpi eq, %1, %222 : vector<16x256xi32>
    %224 = arith.extui %223 : vector<16x256xi1> to vector<16x256xi32>
    %225 = arith.sitofp %224 : vector<16x256xi32> to vector<16x256xf32>
    %226 = arith.mulf %210, %225 : vector<16x256xf32>
    %cst_90 = arith.constant dense<0.000000e+00> : vector<16xf32>
    %227 = vector.multi_reduction <add>, %226, %cst_90 [1] : vector<16x256xf32> to vector<16xf32>
    %228 = vector.shape_cast %227 : vector<16xf32> to vector<16x1xf32>
    %c0_i32 = arith.constant 0 : i32
    %229 = vector.broadcast %c0_i32 : i32 to vector<16x1xi32>
    %230 = arith.cmpi sge, %212, %229 : vector<16x1xi32>
    %231 = arith.extui %230 : vector<16x1xi1> to vector<16x1xi32>
    %232 = arith.sitofp %231 : vector<16x1xi32> to vector<16x1xf32>
    %233 = arith.subf %221, %228 : vector<16x1xf32>
    %234 = arith.mulf %233, %232 : vector<16x1xf32>
    %235 = vector.shape_cast %234 : vector<16x1xf32> to vector<1x16x1xf32>
    %cst_91 = arith.constant dense<0.000000e+00> : vector<1xf32>
    %236 = vector.multi_reduction <add>, %235, %cst_91 [1, 2] : vector<1x16x1xf32> to vector<1xf32>
    %237 = vector.shape_cast %236 : vector<1xf32> to vector<1x1x1xf32>
    %238 = vector.extract %237[0, 0, 0] : f32 from vector<1x1x1xf32>
    %239 = vector.shape_cast %232 : vector<16x1xf32> to vector<1x16x1xf32>
    %cst_92 = arith.constant dense<0.000000e+00> : vector<1xf32>
    %240 = vector.multi_reduction <add>, %239, %cst_92 [1, 2] : vector<1x16x1xf32> to vector<1xf32>
    %241 = vector.shape_cast %240 : vector<1xf32> to vector<1x1x1xf32>
    %242 = vector.extract %241[0, 0, 0] : f32 from vector<1x1x1xf32>
    %cst_93 = arith.constant 1.000000e+00 : f32
    %243 = arith.maximumf %242, %cst_93 : f32
    %244 = arith.divf %238, %243 : f32
    %245 = vector.broadcast %244 : f32 to vector<1x128xf32>
    %c0_94 = arith.constant 0 : index
    %c0_95 = arith.constant 0 : index
    %246 = vector.load %arg23[%c0_94, %c0_95] : memref<1x128xf32, #tpu.memory_space<vmem>>, vector<1x128xf32>
    tpu.vector_store %arg23[%c0_94, %c0_95], %245 {strides = array<i32>} : memref<1x128xf32, #tpu.memory_space<vmem>>, vector<1x128xf32>,
    return
  }
  func.func @transform_0(%arg0: i32) -> (i32, i32) {
    %c0_i32 = arith.constant 0 : i32
    %c0_i32_0 = arith.constant 0 : i32
    %c0_i32_1 = arith.constant 0 : i32
    return %c0_i32, %c0_i32_0 : i32, i32
  }
  func.func @transform_1(%arg0: i32) -> (i32, i32) {
    %c0_i32 = arith.constant 0 : i32
    %c0_i32_0 = arith.constant 0 : i32
    %c0_i32_1 = arith.constant 0 : i32
    return %c0_i32, %c0_i32_0 : i32, i32
  }
  func.func @transform_2(%arg0: i32) -> (i32, i32, i32) {
    %c0_i32 = arith.constant 0 : i32
    %c0_i32_0 = arith.constant 0 : i32
    %c0_i32_1 = arith.constant 0 : i32
    %c0_i32_2 = arith.constant 0 : i32
    return %c0_i32, %c0_i32_0, %c0_i32_1 : i32, i32, i32
  }
  func.func @transform_3(%arg0: i32) -> (i32, i32) {
    %c0_i32 = arith.constant 0 : i32
    %c0_i32_0 = arith.constant 0 : i32
    %c0_i32_1 = arith.constant 0 : i32
    return %c0_i32, %c0_i32_0 : i32, i32
  }
  func.func @transform_4(%arg0: i32) -> (i32, i32) {
    %c0_i32 = arith.constant 0 : i32
    %c0_i32_0 = arith.constant 0 : i32
    %c0_i32_1 = arith.constant 0 : i32
    return %c0_i32, %c0_i32_0 : i32, i32
  }
  func.func @transform_5(%arg0: i32) -> (i32, i32) {
    %c0_i32 = arith.constant 0 : i32
    %c0_i32_0 = arith.constant 0 : i32
    %c0_i32_1 = arith.constant 0 : i32
    return %c0_i32, %c0_i32_0 : i32, i32
  }
  func.func @transform_6(%arg0: i32) -> (i32, i32) {
    %c0_i32 = arith.constant 0 : i32
    %c0_i32_0 = arith.constant 0 : i32
    %c0_i32_1 = arith.constant 0 : i32
    return %c0_i32, %c0_i32_0 : i32, i32
  }
  func.func @transform_7(%arg0: i32) -> (i32, i32) {
    %c0_i32 = arith.constant 0 : i32
    %c0_i32_0 = arith.constant 0 : i32
    %c0_i32_1 = arith.constant 0 : i32
    return %c0_i32, %c0_i32_0 : i32, i32
  }
  func.func @transform_8(%arg0: i32) -> (i32, i32) {
    %c0_i32 = arith.constant 0 : i32
    %c0_i32_0 = arith.constant 0 : i32
    %c0_i32_1 = arith.constant 0 : i32
    return %c0_i32, %c0_i32_0 : i32, i32
  }
  func.func @transform_9(%arg0: i32) -> (i32, i32) {
    %c0_i32 = arith.constant 0 : i32
    %c0_i32_0 = arith.constant 0 : i32
    %c0_i32_1 = arith.constant 0 : i32
    return %c0_i32, %c0_i32_0 : i32, i32
  }
  func.func @transform_10(%arg0: i32) -> (i32, i32) {
    %c0_i32 = arith.constant 0 : i32
    %c0_i32_0 = arith.constant 0 : i32
    %c0_i32_1 = arith.constant 0 : i32
    return %c0_i32, %c0_i32_0 : i32, i32
  }
  func.func @transform_11(%arg0: i32) -> (i32, i32) {
    %c0_i32 = arith.constant 0 : i32
    %c0_i32_0 = arith.constant 0 : i32
    %c0_i32_1 = arith.constant 0 : i32
    return %c0_i32, %c0_i32_0 : i32, i32
  }
  func.func @transform_12(%arg0: i32) -> (i32, i32) {
    %c0_i32 = arith.constant 0 : i32
    %c0_i32_0 = arith.constant 0 : i32
    %c0_i32_1 = arith.constant 0 : i32
    return %c0_i32, %c0_i32_0 : i32, i32
  }
  func.func @transform_13(%arg0: i32) -> (i32, i32) {
    %c0_i32 = arith.constant 0 : i32
    %c0_i32_0 = arith.constant 0 : i32
    %c0_i32_1 = arith.constant 0 : i32
    return %c0_i32, %c0_i32_0 : i32, i32
  }
  func.func @transform_14(%arg0: i32) -> (i32, i32) {
    %c0_i32 = arith.constant 0 : i32
    %c0_i32_0 = arith.constant 0 : i32
    %c0_i32_1 = arith.constant 0 : i32
    return %c0_i32, %c0_i32_0 : i32, i32
  }
  func.func @transform_15(%arg0: i32) -> (i32, i32) {
    %c0_i32 = arith.constant 0 : i32
    %c0_i32_0 = arith.constant 0 : i32
    %c0_i32_1 = arith.constant 0 : i32
    return %c0_i32, %c0_i32_0 : i32, i32
  }
  func.func @transform_16(%arg0: i32) -> (i32, i32) {
    %c0_i32 = arith.constant 0 : i32
    %c0_i32_0 = arith.constant 0 : i32
    %c0_i32_1 = arith.constant 0 : i32
    return %c0_i32, %c0_i32_0 : i32, i32
  }
  func.func @transform_17(%arg0: i32) -> (i32, i32) {
    %c0_i32 = arith.constant 0 : i32
    %c0_i32_0 = arith.constant 0 : i32
    %c0_i32_1 = arith.constant 0 : i32
    return %c0_i32, %c0_i32_0 : i32, i32
  }
  func.func @transform_18(%arg0: i32) -> (i32, i32) {
    %c0_i32 = arith.constant 0 : i32
    %c0_i32_0 = arith.constant 0 : i32
    %c0_i32_1 = arith.constant 0 : i32
    return %c0_i32, %c0_i32_0 : i32, i32
  }
  func.func @transform_19(%arg0: i32) -> (i32, i32) {
    %c0_i32 = arith.constant 0 : i32
    %c0_i32_0 = arith.constant 0 : i32
    %c0_i32_1 = arith.constant 0 : i32
    return %c0_i32, %c0_i32_0 : i32, i32
  }
  func.func @transform_20(%arg0: i32) -> (i32, i32) {
    %c0_i32 = arith.constant 0 : i32
    %c0_i32_0 = arith.constant 0 : i32
    %c0_i32_1 = arith.constant 0 : i32
    return %c0_i32, %c0_i32_0 : i32, i32
  }
  func.func @transform_21(%arg0: i32) -> (i32, i32) {
    %c0_i32 = arith.constant 0 : i32
    %c0_i32_0 = arith.constant 0 : i32
    %c0_i32_1 = arith.constant 0 : i32
    return %c0_i32, %c0_i32_0 : i32, i32
  }
  func.func @transform_22(%arg0: i32) -> (i32, i32) {
    %c0_i32 = arith.constant 0 : i32
    %c0_i32_0 = arith.constant 0 : i32
    %c0_i32_1 = arith.constant 0 : i32
    return %c0_i32, %c0_i32_0 : i32, i32
  }
}

</mosaic_0001>

<bundles_post_ra>
// kernel: stage1_forward.1
= control target key start
LH: loop header
LB: loop body
LE: loop exit
PB: predicated region body
PF: predicated region fallthrough
CT: control target
= control target key end

     0   :  { %s4478_s0 = inlined_call_operand.vmem [shape: s32[16,1], index: 0, kind: input, shape index: {}]   ;;  %s4479_s1 = inlined_call_operand.vmem [shape: s32[16,1], index: 1, kind: input, shape index: {}]   ;;  %s4480_s2 = inlined_call_operand.vmem [shape: f32[2,8,8], index: 2, kind: input, shape index: {}]   ;;  %s4481_s3 = inlined_call_operand.hbm [shape: f32[256,128], index: 3, kind: input, shape index: {}]   ;;  %s4482_s4 = inlined_call_operand.vmem [shape: f32[16,128], index: 4, kind: input, shape index: {}]   ;;  %s4483_s5 = inlined_call_operand.vmem [shape: f32[1,128], index: 5, kind: input, shape index: {}]   ;;  %s4484_s6 = inlined_call_operand.vmem [shape: f32[1,128], index: 6, kind: input, shape index: {}]   ;;  %s4485_s7 = inlined_call_operand.hbm [shape: f32[128,384], index: 7, kind: input, shape index: {}]   ;;  %s4486_s8 = inlined_call_operand.vmem [shape: f32[1,384], index: 8, kind: input, shape index: {}]   ;;  %s4487_s9 = inlined_call_operand.vmem [shape: f32[128,128], index: 9, kind: input, shape index: {}]   ;;  %s4488_s10 = inlined_call_operand.vmem [shape: f32[1,128], index: 10, kind: input, shape index: {}]   ;;  %s4489_s11 = inlined_call_operand.vmem [shape: f32[1,128], index: 11, kind: input, shape index: {}]   ;;  %s4490_s12 = inlined_call_operand.vmem [shape: f32[1,128], index: 12, kind: input, shape index: {}]   ;;  %s4491_s13 = inlined_call_operand.hbm [shape: f32[128,512], index: 13, kind: input, shape index: {}]   ;;  %s4492_s14 = inlined_call_operand.vmem [shape: f32[1,512], index: 14, kind: input, shape index: {}]   ;;  %s4493_s15 = inlined_call_operand.hbm [shape: f32[512,128], index: 15, kind: input, shape index: {}]   ;;  %s4494_s16 = inlined_call_operand.vmem [shape: f32[1,128], index: 16, kind: input, shape index: {}]   ;;  %s4495_s17 = inlined_call_operand.vmem [shape: f32[1,128], index: 17, kind: input, shape index: {}]   ;;  %s4496_s18 = inlined_call_operand.vmem [shape: f32[1,128], index: 18, kind: input, shape index: {}]   ;;  %s4497_s19 = inlined_call_operand.hbm [shape: f32[128,256], index: 19, kind: input, shape index: {}]   ;;  %s4498_s20 = inlined_call_operand.vmem [shape: f32[1,256], index: 20, kind: input, shape index: {}]   ;;  %s4499_s21 = inlined_call_operand.hbm [shape: f32[16,256], index: 21, kind: output, shape index: {0}]   ;;  %s4500_s22 = inlined_call_operand.hbm [shape: f32[1,128], index: 22, kind: output, shape index: {1}]  }
   0x1   :  { %4507 = sst [smem:[#allocation19_spill]] %s4478_s0 }
   0x2   :  { %4508 = sst [smem:[#allocation20_spill]] %s4479_s1 }
   0x3   :  { %4509 = sst [smem:[#allocation21_spill]] %s4480_s2 }
   0x4   :  { %4510 = sst [smem:[#allocation22_spill]] %s4481_s3 }
   0x5   :  { %4511 = sst [smem:[#allocation23_spill]] %s4482_s4 }
   0x6   :  { %4512 = sst [smem:[#allocation24_spill]] %s4483_s5 }
   0x7   :  { %4513 = sst [smem:[#allocation25_spill]] %s4484_s6 }
   0x8   :  { %4514 = sst [smem:[#allocation26_spill]] %s4500_s22 }
   0x9   :  { %28 = vsyncpa [#allocation3], 0 }
   0xa   :  { %29 = vsyncpa [#allocation6], 0 }
   0xb   :  { %30 = vsyncpa [#allocation9], 0 }
   0xc   :  { %31 = vsyncpa [#allocation4], 0 }
   0xd   :  { %32 = vsyncpa [#allocation13], 0  ;;  %s3822_s3 = smov [#allocation5]   ;;  %s3658_s4 = scalar_lea.hbm %s4485_s7, 6144 }
   0xe   :  { %s62_s28 = sshll.u32 %s3822_s3, 4  ;;  %p3659_p0 = scmp.ne.s32.totalorder %s4485_s7, %s3658_s4  ;;  %s63_s28 = int_to_ptr.vmem [resolvable:$true] %s62_s28 }
   0xf   :  { %p3662_p1 = scmp.lt.u32.totalorder %s3658_s4, %s4485_s7 }
  0x11   :  { %p3664_p2 = pnand %p3662_p1, %p3659_p0 }
  0x13   :  { %3667 = shalt.err (!%p3664_p2)
}
  0x14   :  { %s3668_s24 = scalar_lea.vmem %s63_s28, 6144  ;;  %p3673_p4 = scmp.lt.s32.totalorder %s63_s28, %s63_s28 }
  0x15   :  { %p3669_p3 = scmp.ne.s32.totalorder %s63_s28, %s3668_s24  ;;  %p3674_p5 = scmp.lt.s32.totalorder %s3668_s24, %s3668_s24 }
  0x17   :  { %p3675_p6 = por %p3674_p5, %p3673_p4 }
  0x19   :  { %p3676_p7 = pnand %p3675_p6, %p3669_p3 }
  0x1b   :  { %3679 = shalt.err (!%p3676_p7)
}
  0x1c   :  { %s3823_s6 = smov 384   ;;  %s3824_s25 = smov 24  }
  0x1d   :  { %68 = dma.hbm_to_vmem [thread:$0]  %s4485_s7, 6144, %s63_s28, [#allocation6], %s3823_s6, %s3823_s6, %s3824_s25  }
  0x1e   :  { %s3825_s27 = smov [#allocation8]   ;;  %s3826_s29 = smov [#allocation2]  }
  0x1f   :  { %s98_s3 = sshll.u32 %s3825_s27, 4  ;;  %s44_s30 = sshll.u32 %s3826_s29, 4  ;;  %s99_s3 = int_to_ptr.vmem [resolvable:$true] %s98_s3  ;;  %s45_s30 = int_to_ptr.vmem [resolvable:$true] %s44_s30 }
  0x20   :  { %s3680_s23 = scalar_lea.hbm %s4493_s15, 8192 }
  0x21   :  { %p3681_p8 = scmp.ne.s32.totalorder %s4493_s15, %s3680_s23  ;;  %p3684_p9 = scmp.lt.u32.totalorder %s3680_s23, %s4493_s15 }
  0x23   :  { %p3686_p10 = pnand %p3684_p9, %p3681_p8 }
  0x25   :  { %3689 = shalt.err (!%p3686_p10)
}
  0x26   :  { %s3690_s7 = scalar_lea.vmem %s99_s3, 8192  ;;  %p3695_p12 = scmp.lt.s32.totalorder %s99_s3, %s99_s3 }
  0x27   :  { %p3691_p11 = scmp.ne.s32.totalorder %s99_s3, %s3690_s7  ;;  %p3696_p13 = scmp.lt.s32.totalorder %s3690_s7, %s3690_s7 }
  0x29   :  { %p3697_p0 = por %p3696_p13, %p3695_p12 }
  0x2b   :  { %p3698_p1 = pnand %p3697_p0, %p3691_p11 }
  0x2d   :  { %3701 = shalt.err (!%p3698_p1)
}
  0x2e   :  { %s3827_s28 = smov 128   ;;  %s3828_s6 = smov 8  }
  0x2f   :  { %104 = dma.hbm_to_vmem [thread:$0]  %s4493_s15, 8192, %s99_s3, [#allocation9], %s3827_s28, %s3827_s28, %s3828_s6  }
  0x30   :  { %s4515_s22 = sld [smem:[#allocation22_spill]] }
  0x36   :  { %s3702_s29 = scalar_lea.hbm %s4515_s22, 4096 }
  0x37   :  { %p3703_p2 = scmp.ne.s32.totalorder %s4515_s22, %s3702_s29  ;;  %p3706_p3 = scmp.lt.u32.totalorder %s3702_s29, %s4515_s22 }
  0x39   :  { %p3708_p4 = pnand %p3706_p3, %p3703_p2 }
  0x3b   :  { %3711 = shalt.err (!%p3708_p4)
}
  0x3c   :  { %s3712_s5 = scalar_lea.vmem %s45_s30, 4096  ;;  %p3717_p6 = scmp.lt.s32.totalorder %s45_s30, %s45_s30 }
  0x3d   :  { %p3713_p5 = scmp.ne.s32.totalorder %s45_s30, %s3712_s5  ;;  %p3718_p7 = scmp.lt.s32.totalorder %s3712_s5, %s3712_s5 }
  0x3f   :  { %p3719_p8 = por %p3718_p7, %p3717_p6 }
  0x41   :  { %p3720_p9 = pnand %p3719_p8, %p3713_p5 }
  0x43   :  { %3723 = shalt.err (!%p3720_p9)
}
  0x44   :  { %50 = dma.hbm_to_vmem [thread:$0]  %s4515_s22, 4096, %s45_s30, [#allocation3], %s3827_s28, %s3827_s28, %s3828_s6  }
  0x45   :  { %s3829_s24 = smov [#allocation7]   ;;  %s3724_s2 = scalar_lea.hbm %s4491_s13, 8192 }
  0x46   :  { %s84_s7 = sshll.u32 %s3829_s24, 4  ;;  %p3725_p10 = scmp.ne.s32.totalorder %s4491_s13, %s3724_s2  ;;  %s85_s7 = int_to_ptr.vmem [resolvable:$true] %s84_s7 }
  0x47   :  { %p3728_p11 = scmp.lt.u32.totalorder %s3724_s2, %s4491_s13 }
  0x49   :  { %p3730_p12 = pnand %p3728_p11, %p3725_p10 }
  0x4b   :  { %3733 = shalt.err (!%p3730_p12)
}
  0x4c   :  { %s3734_s23 = scalar_lea.vmem %s85_s7, 8192  ;;  %p3739_p0 = scmp.lt.s32.totalorder %s85_s7, %s85_s7 }
  0x4d   :  { %p3735_p13 = scmp.ne.s32.totalorder %s85_s7, %s3734_s23  ;;  %p3740_p1 = scmp.lt.s32.totalorder %s3734_s23, %s3734_s23 }
  0x4f   :  { %p3741_p2 = por %p3740_p1, %p3739_p0 }
  0x51   :  { %p3742_p3 = pnand %p3741_p2, %p3735_p13 }
  0x53   :  { %3745 = shalt.err (!%p3742_p3)
}
  0x54   :  { %s3830_s30 = smov 512   ;;  %s3831_s28 = smov 32  }
  0x55   :  { %90 = dma.hbm_to_vmem [thread:$0]  %s4491_s13, 8192, %s85_s7, [#allocation6], %s3830_s30, %s3830_s30, %s3831_s28  }
  0x56   :  { %s3832_s1 = smov [#allocation10]   ;;  %s3746_s24 = scalar_lea.hbm %s4497_s19, 4096 }
  0x57   :  { %s116_s5 = sshll.u32 %s3832_s1, 4  ;;  %p3747_p4 = scmp.ne.s32.totalorder %s4497_s19, %s3746_s24  ;;  %s117_s5 = int_to_ptr.vmem [resolvable:$true] %s116_s5 }
  0x58   :  { %p3750_p5 = scmp.lt.u32.totalorder %s3746_s24, %s4497_s19 }
  0x5a   :  { %p3752_p6 = pnand %p3750_p5, %p3747_p4 }
  0x5c   :  { %3755 = shalt.err (!%p3752_p6)
}
  0x5d   :  { %s3756_s29 = scalar_lea.vmem %s117_s5, 4096  ;;  %p3761_p8 = scmp.lt.s32.totalorder %s117_s5, %s117_s5 }
  0x5e   :  { %p3757_p7 = scmp.ne.s32.totalorder %s117_s5, %s3756_s29  ;;  %p3762_p9 = scmp.lt.s32.totalorder %s3756_s29, %s3756_s29 }
  0x60   :  { %p3763_p10 = por %p3762_p9, %p3761_p8 }
  0x62   :  { %p3764_p11 = pnand %p3763_p10, %p3757_p7 }
  0x64   :  { %3767 = shalt.err (!%p3764_p11)
}
  0x65   :  { %s3833_s13 = smov 256   ;;  %s3834_s7 = smov 16  }
  0x66   :  { %122 = dma.hbm_to_vmem [thread:$0]  %s4497_s19, 4096, %s117_s5, [#allocation9], %s3833_s13, %s3833_s13, %s3834_s7  }
  0x67   :  { %3812 = dma.done.wait [#allocation3], 4096  }
  0x68   :  { %3813 = vsyncadd [#allocation3], 4294963200 }
  0x69   :  { %3814 = dma.done.wait [#allocation6], 14336  }
  0x6a   :  { %3815 = vsyncadd [#allocation6], 4294952960 }
  0x6b   :  { %3816 = dma.done.wait [#allocation9], 12288  }
  0x6c   :  { %3817 = vsyncadd [#allocation9], 4294955008  ;;  %v3835_v0 = vmov 0   ;;  %s4516_s6 = sld [smem:[#allocation19_spill]]  ;;  %v179_v3 = vld [vmem:[#allocation2 + $0x80] sm:$0xff]  ;;  %v180_v4 = vld [vmem:[#allocation2 + $0x88] sm:$0xff]  ;;  %v142_v51 = vlaneseq }
  0x6d   :  { %3567 = vset.pattern.permute.xlu0 %v3835_v0  ;;  %3583 = vset.pattern.permute.xlu1 %v3835_v0  ;;  %v163_v5 = vld [vmem:[#allocation2] sm:$0xff]  ;;  %v164_v6 = vld [vmem:[#allocation2 + $0x8] sm:$0xff]  ;;  %v3251_v7 = vpack.c.bf16 %v180_v4, %v179_v3  ;;  %v181_v9 = vld [vmem:[#allocation2 + $0x90] sm:$0xff]  ;;  %v3836_v55 = vmov 1.0   ;;  %s4517_s15 = sld [smem:[#allocation23_spill]]  ;;  %s4518_s2 = sld [smem:[#allocation24_spill]] }
  0x6e   :  { %v3253_v8 = vpack.c.bf16 %v164_v6, %v163_v5  ;;  %v182_v10 = vld [vmem:[#allocation2 + $0x98] sm:$0xff]  ;;  %v165_v11 = vld [vmem:[#allocation2 + $0x10] sm:$0xff]  ;;  %v183_v14 = vld [vmem:[#allocation2 + $0xa0] sm:$0xff]  ;;  %v4030_v52 = vand.u32 127, %v142_v51  ;;  %s4519_s4 = sld [smem:[#allocation25_spill]]  ;;  %vm3838_vm4 = vmmov 0  }
  0x6f   :  { %v3255_v12 = vpack.c.bf16 %v182_v10, %v181_v9  ;;  %v166_v13 = vld [vmem:[#allocation2 + $0x18] sm:$0xff]  ;;  %v184_v15 = vld [vmem:[#allocation2 + $0xa8] sm:$0xff]  ;;  %3252 = vmatprep.subr.bf16.mxu0 %v3251_v7  ;;  %v167_v18 = vld [vmem:[#allocation2 + $0x20] sm:$0xff]  ;;  %vm532_vm5 = vcmask 261120   ;;  %s4520_s22 = sld [smem:[#allocation21_spill]]  ;;  %vm689_vm6 = vcmask 64512  }
  0x70   :  { %3254 = vmatpush3.bf16.msra.mxu0 %v3253_v8  ;;  %v3257_v16 = vpack.c.bf16 %v166_v13, %v165_v11  ;;  %v3259_v17 = vpack.c.bf16 %v184_v15, %v183_v14  ;;  %v168_v19 = vld [vmem:[#allocation2 + $0x28] sm:$0xff]  ;;  %v185_v20 = vld [vmem:[#allocation2 + $0xb0] sm:$0xff]  ;;  %v186_v21 = vld [vmem:[#allocation2 + $0xb8] sm:$0xff]  ;;  %v4033_v53 = vadd.s32 128, %v4030_v52  ;;  %s3840_s5 = smov 64   ;;  %vm1888_vm7 = vcmask 523264  }
  0x71   :  { %3256 = vmatprep.subr.bf16.mxu0 %v3255_v12  ;;  %v3261_v22 = vpack.c.bf16 %v168_v19, %v167_v18  ;;  %v3263_v23 = vpack.c.bf16 %v186_v21, %v185_v20  ;;  %v169_v24 = vld [vmem:[#allocation2 + $0x30] sm:$0xff]  ;;  %v170_v25 = vld [vmem:[#allocation2 + $0x38] sm:$0xff]  ;;  %v187_v26 = vld [vmem:[#allocation2 + $0xc0] sm:$0xff]  ;;  %vm1891_vm8 = vcmask 785408   ;;  %vm2808_vm15 = vcmask 7168   ;;  %s3841_s27 = smov [#allocation11]  }
  0x72   :  { %v140_v1 = vld [vmem:[%s4516_s6] sm:$0xff]  ;;  %v141_v2 = vld [vmem:[%s4516_s6 + $0x8] sm:$0xff]  ;;  %v3265_v28 = vpack.c.bf16 %v170_v25, %v169_v24  ;;  %v189_v32 = vld [vmem:[#allocation2 + $0xd0] sm:$0xff]  ;;  %s2845_s29 = sshll.u32 %s3841_s27, 4  ;;  %s2846_s29 = int_to_ptr.vmem [resolvable:$true] %s2845_s29 }
  0x73   :  { %146 = vperm.xlu0 %3567, %v140_v1   ;;  %v188_v27 = vld [vmem:[#allocation2 + $0xc8] sm:$0xff]  ;;  %v171_v30 = vld [vmem:[#allocation2 + $0x40] sm:$0xff]  ;;  %v190_v33 = vld [vmem:[#allocation2 + $0xd8] sm:$0xff]  ;;  %p3773_p13 = scmp.lt.s32.totalorder %s2846_s29, %s2846_s29 }
  0x74   :  { %3258 = vmatpush3.bf16.msra.mxu0 %v3257_v16  ;;  %v3267_v29 = vpack.c.bf16 %v188_v27, %v187_v26  ;;  %v172_v31 = vld [vmem:[#allocation2 + $0x48] sm:$0xff]  ;;  %v3271_v35 = vpack.c.bf16 %v190_v33, %v189_v32  ;;  %v173_v36 = vld [vmem:[#allocation2 + $0x50] sm:$0xff]  ;;  %v174_v37 = vld [vmem:[#allocation2 + $0x58] sm:$0xff] }
  0x75   :  { %3260 = vmatprep.subr.bf16.mxu0 %v3259_v17  ;;  %v3269_v34 = vpack.c.bf16 %v172_v31, %v171_v30  ;;  %v191_v38 = vld [vmem:[#allocation2 + $0xe0] sm:$0xff]  ;;  %v192_v39 = vld [vmem:[#allocation2 + $0xe8] sm:$0xff]  ;;  %v3273_v40 = vpack.c.bf16 %v174_v37, %v173_v36  ;;  %v193_v44 = vld [vmem:[#allocation2 + $0xf0] sm:$0xff] }
  0x76   :  { %v3275_v41 = vpack.c.bf16 %v192_v39, %v191_v38  ;;  %v175_v42 = vld [vmem:[#allocation2 + $0x60] sm:$0xff]  ;;  %v176_v43 = vld [vmem:[#allocation2 + $0x68] sm:$0xff]  ;;  %v194_v45 = vld [vmem:[#allocation2 + $0xf8] sm:$0xff] }
  0x77   :  { %149 = vperm.xlu0 %3567, %v141_v2   ;;  %v3277_v46 = vpack.c.bf16 %v176_v43, %v175_v42  ;;  %v3279_v47 = vpack.c.bf16 %v194_v45, %v193_v44  ;;  %v177_v48 = vld [vmem:[#allocation2 + $0x70] sm:$0xff]  ;;  %v178_v49 = vld [vmem:[#allocation2 + $0x78] sm:$0xff]  ;;  %v195_v58 = vld [vmem:[%s4517_s15] sm:$0xff] }
  0x78   :  { %3262 = vmatpush3.bf16.msra.mxu0 %v3261_v22  ;;  %v3281_v50 = vpack.c.bf16 %v178_v49, %v177_v48  ;;  %v196_v63 = vld [vmem:[%s4517_s15 + $0x8] sm:$0xff]  ;;  %v317_v4 = vld [vmem:[#allocation5 + $0x20] sm:$0xff]  ;;  %v316_v7 = vld [vmem:[#allocation5 + $0x18] sm:$0xff] }
  0x79   :  { %3264 = vmatprep.subr.bf16.mxu0 %v3263_v23  ;;  %v314_v3 = vld [vmem:[#allocation5 + $0x8] sm:$0xff]  ;;  %v313_v5 = vld [vmem:[#allocation5] sm:$0xff]  ;;  %v320_v8 = vld [vmem:[#allocation5 + $0x38] sm:$0xff] }
  0x7a   :  { %v3283_v6 = vpack.c.bf16 %v317_v4, %v314_v3  ;;  %v323_v9 = vld [vmem:[#allocation5 + $0x50] sm:$0xff]  ;;  %v3285_v10 = vpack.c.bf16 %v316_v7, %v313_v5  ;;  %v318_v13 = vld [vmem:[#allocation5 + $0x28] sm:$0xff]  ;;  %v329_v18 = vld [vmem:[#allocation5 + $0x80] sm:$0xff] }
  0x7b   :  { %v3287_v11 = vpack.c.bf16 %v323_v9, %v320_v8  ;;  %v315_v12 = vld [vmem:[#allocation5 + $0x10] sm:$0xff]  ;;  %v322_v16 = vld [vmem:[#allocation5 + $0x48] sm:$0xff]  ;;  %v321_v20 = vld [vmem:[#allocation5 + $0x40] sm:$0xff] }
  0x7c   :  { %3266 = vmatpush3.bf16.msra.mxu0 %v3265_v28  ;;  %v319_v14 = vld [vmem:[#allocation5 + $0x30] sm:$0xff]  ;;  %3284 = vmatprep.subr.bf16.mxu1 %v3283_v6  ;;  %v3315_v15 = vpack.c.bf16 %v318_v13, %v315_v12  ;;  %v326_v17 = vld [vmem:[#allocation5 + $0x68] sm:$0xff]  ;;  %v324_v21 = vld [vmem:[#allocation5 + $0x58] sm:$0xff] }
  0x7d   :  { %3268 = vmatprep.subr.bf16.mxu0 %v3267_v29  ;;  %3286 = vmatpush1.bf16.msra.mxu1 %v3285_v10  ;;  %v3289_v19 = vpack.c.bf16 %v322_v16, %v319_v14  ;;  %v3291_v22 = vpack.c.bf16 %v329_v18, %v326_v17  ;;  %v3319_v23 = vpack.c.bf16 %v324_v21, %v321_v20  ;;  %v325_v24 = vld [vmem:[#allocation5 + $0x60] sm:$0xff]  ;;  %v328_v25 = vld [vmem:[#allocation5 + $0x78] sm:$0xff]  ;;  %v335_v36 = vld [vmem:[#allocation5 + $0xb0] sm:$0xff]  ;;  %v3837_v10 = vmov 0.0  }
  0x7e   :  { %3288 = vmatprep.subr.bf16.mxu1 %v3287_v11  ;;  %v3293_v26 = vpack.c.bf16 %v328_v25, %v325_v24  ;;  %v327_v37 = vld [vmem:[#allocation5 + $0x70] sm:$0xff]  ;;  %v330_v39 = vld [vmem:[#allocation5 + $0x88] sm:$0xff]  ;;  %v341_v45 = vld [vmem:[#allocation5 + $0xe0] sm:$0xff]  ;;  %442 = vmatprep.mubr.f32.mxu1 %v3837_v10 }
  0x7f   :  { %v3323_v42 = vpack.c.bf16 %v330_v39, %v327_v37  ;;  %v338_v44 = vld [vmem:[#allocation5 + $0xc8] sm:$0xff]  ;;  %v336_v48 = vld [vmem:[#allocation5 + $0xb8] sm:$0xff]  ;;  %v337_v49 = vld [vmem:[#allocation5 + $0xc0] sm:$0xff] }
  0x80   :  { %3270 = vmatpush3.bf16.msra.mxu0 %v3269_v34  ;;  %v350_v3 = vld [vmem:[#allocation5 + $0x128] sm:$0xff]  ;;  %v353_v4 = vld [vmem:[#allocation5 + $0x140] sm:$0xff]  ;;  %v348_v7 = vld [vmem:[#allocation5 + $0x118] sm:$0xff] }
  0x81   :  { %3272 = vmatprep.subr.bf16.mxu0 %v3271_v35  ;;  %3290 = vmatpush1.bf16.msra.mxu1 %v3289_v19  ;;  %v332_v35 = vld [vmem:[#allocation5 + $0x98] sm:$0xff]  ;;  %v345_v5 = vld [vmem:[#allocation5 + $0x100] sm:$0xff]  ;;  %v3307_v6 = vpack.c.bf16 %v353_v4, %v350_v3  ;;  %v359_v14 = vld [vmem:[#allocation5 + $0x170] sm:$0xff] }
  0x82   :  { %3292 = vmatprep.subr.bf16.mxu1 %v3291_v22  ;;  %v3295_v38 = vpack.c.bf16 %v335_v36, %v332_v35  ;;  %v349_v8 = vld [vmem:[#allocation5 + $0x120] sm:$0xff]  ;;  %v352_v9 = vld [vmem:[#allocation5 + $0x138] sm:$0xff]  ;;  %v3335_v11 = vpack.c.bf16 %v348_v7, %v345_v5  ;;  %v354_v17 = vld [vmem:[#allocation5 + $0x148] sm:$0xff] }
  0x83   :  { %v3309_v12 = vpack.c.bf16 %v352_v9, %v349_v8  ;;  %v356_v13 = vld [vmem:[#allocation5 + $0x158] sm:$0xff]  ;;  %v355_v18 = vld [vmem:[#allocation5 + $0x150] sm:$0xff]  ;;  %v358_v19 = vld [vmem:[#allocation5 + $0x168] sm:$0xff] }
  0x84   :  { %3274 = vmatpush3.bf16.msra.mxu0 %v3273_v40  ;;  %v331_v40 = vld [vmem:[#allocation5 + $0x90] sm:$0xff]  ;;  %v3311_v16 = vpack.c.bf16 %v359_v14, %v356_v13  ;;  %v3313_v21 = vpack.c.bf16 %v358_v19, %v355_v18  ;;  %v357_v22 = vld [vmem:[#allocation5 + $0x160] sm:$0xff]  ;;  %v4133_v7 = vld [vmem:[%s4520_s22 + $0x8] sm:$0xff] }
  0x85   :  { %3276 = vmatprep.subr.bf16.mxu0 %v3275_v41  ;;  %3294 = vmatpush1.bf16.msra.mxu1 %v3293_v26  ;;  %v334_v41 = vld [vmem:[#allocation5 + $0xa8] sm:$0xff]  ;;  %v2882_v36 = vld [vmem:[%s4519_s4] ss:$0 sm:$0xff]  ;;  %s3768_s4 = scalar_lea.vmem %s2846_s29, 512 }
  0x86   :  { %v3297_v43 = vpack.c.bf16 %v334_v41, %v331_v40  ;;  %3296 = vmatprep.subr.bf16.mxu1 %v3295_v38  ;;  %p3769_p12 = scmp.ne.s32.totalorder %s2846_s29, %s3768_s4  ;;  %p3774_p0 = scmp.lt.s32.totalorder %s3768_s4, %s3768_s4 }
  0x88   :  { %3278 = vmatpush3.bf16.msra.mxu0 %v3277_v46  ;;  %v333_v46 = vld [vmem:[#allocation5 + $0xa0] sm:$0xff]  ;;  %p3775_p1 = por %p3774_p0, %p3773_p13 }
  0x89   :  { %3280 = vmatprep.subr.bf16.mxu0 %v3279_v47  ;;  %3298 = vmatpush1.bf16.msra.mxu1 %v3297_v43  ;;  %v3299_v47 = vpack.c.bf16 %v341_v45, %v338_v44  ;;  %v361_v43 = vld [vmem:[%s4486_s8] sm:$0x7]  ;;  %s3839_s8 = smov 96  }
  0x8a   :  { %p3776_p2 = pnand %p3775_p1, %p3769_p12 }
  0x8b   :  { %3300 = vmatprep.subr.bf16.mxu1 %v3299_v47 }
  0x8c   :  { %3282 = vmatpush3.bf16.msra.mxu0 %v3281_v50  ;;  %v340_v50 = vld [vmem:[#allocation5 + $0xd8] sm:$0xff] }
  0x8d   :  { %3316 = vmatprep.subr.bf16.mxu0 %v3315_v15 }
  0xf2   :  { %v147_v54 = vpop.permute.xlu0 %146 }
  0xf3   :  { %vm151_vm0 = vcmp.eq.s32.totalorder %v4030_v52, %v147_v54  ;;  %vm152_vm1 = vcmp.eq.s32.totalorder %v4033_v53, %v147_v54  ;;  %v3327_v54 = vpack.c.bf16 %v336_v48, %v333_v46 }
  0xf4   :  { %2877 = vmatprep.mubr.msk.f32.mxu0 %vm152_vm1, %v3836_v55 }
  0xf5   :  { %2878 = vmatmul.mubr.msk.f32.vlgmr.msra.gmra.mrb[0].mxu0 %vm151_vm0, %v3836_v55 }
  0xf6   :  { %v150_v56 = vpop.permute.xlu0 %149  ;;  %3318 = vmatpush3.bf16.msra.mxu0 %v3315_v15  ;;  %v351_v15 = vld [vmem:[#allocation5 + $0x130] sm:$0xff] }
  0xf7   :  { %vm153_vm2 = vcmp.eq.s32.totalorder %v4030_v52, %v150_v56  ;;  %vm154_vm3 = vcmp.eq.s32.totalorder %v4033_v53, %v150_v56  ;;  %3320 = vmatprep.subr.bf16.mxu0 %v3319_v23  ;;  %v344_v56 = vld [vmem:[#allocation5 + $0xf8] sm:$0xff]  ;;  %v3339_v20 = vpack.c.bf16 %v354_v17, %v351_v15 }
  0xf8   :  { %2879 = vmatprep.mubr.msk.f32.mxu0 %vm154_vm3, %v3836_v55 }
  0xf9   :  { %2880 = vmatmul.mubr.msk.f32.gmra.mrb[2].mxu0 %vm153_vm2, %v3836_v55  ;;  %v3301_v55 = vpack.c.bf16 %v340_v50, %v337_v49 }
  0xfa   :  { %3322 = vmatpush3.bf16.msra.mxu0 %v3319_v23  ;;  %v360_v23 = vld [vmem:[#allocation5 + $0x178] sm:$0xff] }
  0xfb   :  { %3324 = vmatprep.subr.bf16.mxu0 %v3323_v42  ;;  %3302 = vmatpush1.bf16.msra.mxu1 %v3301_v55  ;;  %v3343_v24 = vpack.c.bf16 %v360_v23, %v357_v22 }
  0xfe   :  { %3326 = vmatpush3.bf16.msra.mxu0 %v3323_v42 }
  0xff   :  { %3328 = vmatprep.subr.bf16.mxu0 %v3327_v54 }
 0x102   :  { %3330 = vmatpush3.bf16.msra.mxu0 %v3327_v54 }
 0x1c8   :  { %v2951_v57 = vpop.f32.mrb[0].mxu0 }
 0x1c9   :  { %v2952_v59 = vpop.f32.mrb[1].mxu0 }
 0x1ca   :  { %v2953_v60 = vadd.f32 %v2952_v59, %v2951_v57  ;;  %v347_v57 = vld [vmem:[#allocation5 + $0x110] sm:$0xff] }
 0x1cb   :  { %v3303_v59 = vpack.c.bf16 %v347_v57, %v344_v56 }
 0x1cc   :  { %v4042_v61 = vadd.f32 %v2953_v60, %v195_v58  ;;  %v2954_v62 = vpop.f32.mrb[2].mxu0  ;;  %v339_v58 = vld [vmem:[#allocation5 + $0xd0] sm:$0xff]  ;;  %v342_v60 = vld [vmem:[#allocation5 + $0xe8] sm:$0xff] }
 0x1cd   :  { %v2955_v0 = vpop.f32.mrb[3].mxu0  ;;  %3304 = vmatprep.subr.bf16.mxu1 %v3303_v59 }
 0x1ce   :  { %v2956_v1 = vadd.f32 %v2955_v0, %v2954_v62  ;;  %274 = vadd.xlane.f32.xlu1 %v4042_v61  ;;  %v343_v62 = vld [vmem:[#allocation5 + $0xf0] sm:$0xff]  ;;  %v3331_v0 = vpack.c.bf16 %v342_v60, %v339_v58 }
 0x1d0   :  { %v4048_v2 = vadd.f32 %v2956_v1, %v196_v63  ;;  %v346_v63 = vld [vmem:[#allocation5 + $0x108] sm:$0xff]  ;;  %3332 = vmatprep.subr.bf16.mxu0 %v3331_v0 }
 0x1d1   :  { %v3305_v1 = vpack.c.bf16 %v346_v63, %v343_v62  ;;  %3334 = vmatpush3.bf16.msra.mxu0 %v3331_v0 }
 0x1d2   :  { %276 = vadd.xlane.f32.xlu1 %v4048_v2  ;;  %3336 = vmatprep.subr.bf16.mxu0 %v3335_v11 }
 0x1d3   :  { %3306 = vmatpush1.bf16.msra.mxu1 %v3305_v1  ;;  %v4127_v1 = vld [vmem:[%s4520_s22] sm:$0xff] }
 0x1d4   :  { %3308 = vmatprep.subr.bf16.mxu1 %v3307_v6 }
 0x1d5   :  { %3338 = vmatpush3.bf16.msra.mxu0 %v3335_v11 }
 0x1d6   :  { %3340 = vmatprep.subr.bf16.mxu0 %v3339_v20 }
 0x1d7   :  { %3310 = vmatpush1.bf16.msra.mxu1 %v3309_v12 }
 0x1d8   :  { %3312 = vmatprep.subr.bf16.mxu1 %v3311_v16 }
 0x1d9   :  { %3342 = vmatpush3.bf16.msra.mxu0 %v3339_v20 }
 0x1da   :  { %3344 = vmatprep.subr.bf16.mxu0 %v3343_v24 }
 0x1db   :  { %3314 = vmatpush1.bf16.msra.mxu1 %v3313_v21 }
 0x1dc   :  { %3136 = vmatprep.subr.mxu1 %v3837_v10 }
 0x1dd   :  { %3346 = vmatpush3.bf16.msra.mxu0 %v3343_v24 }
 0x1de   :  { %3171 = vmatprep.subr.mxu0 %v3837_v10 }
 0x25b   :  { %v275_v27 = vpop.xlane.xlu1 %274 }
 0x25c   :  { %v279_v28 = vmul.f32 0.0078125, %v275_v27 }
 0x25e   :  { %v4052_v29 = vsub.f32 %v4042_v61, %v279_v28 }
 0x25f   :  { %v277_v30 = vpop.xlane.xlu1 %276 }
 0x260   :  { %v280_v31 = vmul.f32 0.0078125, %v277_v30  ;;  %v283_v32 = vmul.f32 %v4052_v29, %v4052_v29 }
 0x262   :  { %v4057_v33 = vsub.f32 %v4048_v2, %v280_v31  ;;  %285 = vadd.xlane.f32.xlu0 %v283_v32 }
 0x264   :  { %v284_v34 = vmul.f32 %v4057_v33, %v4057_v33 }
 0x266   :  { %287 = vadd.xlane.f32.xlu1 %v284_v34  ;;  %v2881_v34 = vld [vmem:[%s4518_s2] ss:$0 sm:$0xff] }
 0x2ef   :  { %v286_v25 = vpop.xlane.xlu0 %285 }
 0x2f0   :  { %v289_v26 = vmul.f32 0.0078125, %v286_v25 }
 0x2f2   :  { %v291_v27 = vadd.f32 1e-05, %v289_v26 }
 0x2f3   :  { %v288_v28 = vpop.xlane.xlu1 %287 }
 0x2f4   :  { %3584 = vrsqrt.f32 %v291_v27  ;;  %v290_v30 = vmul.f32 0.0078125, %v288_v28 }
 0x2f6   :  { %v292_v31 = vadd.f32 1e-05, %v290_v30 }
 0x2f8   :  { %3586 = vrsqrt.f32 %v292_v31 }
 0x2fe   :  { %v3585_v32 = vpop.eup %3584 }
 0x2ff   :  { %v295_v35 = vmul.f32 %v3585_v32, %v4052_v29  ;;  %v4078_v29 = vshrl.u32 %v142_v51, 7 }
 0x301   :  { %v303_v37 = vmul.f32 %v2881_v34, %v295_v35  ;;  %v4087_v44 = vsub.s32 1, %v4078_v29  ;;  %v373_v46 = vsub.s32 2, %v4078_v29 }
 0x302   :  { %v3587_v38 = vpop.eup %3586 }
 0x303   :  { %v311_v39 = vadd.f32 %v2882_v36, %v303_v37  ;;  %v296_v40 = vmul.f32 %v3587_v38, %v4057_v33  ;;  %v4081_v33 = vsub.s32 0, %v4078_v29  ;;  %v370_v47 = vrot.slane %v361_v43, %v4087_v44 }
 0x304   :  { %v374_v50 = vrot.slane %v361_v43, %v373_v46 }
 0x305   :  { %443 = vmatmul.mubr.f32.vlgmr.msra.gmra.mrb[0].mxu1 %v311_v39  ;;  %3133 = vmatprep.mubr.f32.mxu0 %v311_v39  ;;  %v304_v41 = vmul.f32 %v2881_v34, %v296_v40  ;;  %v366_v45 = vrot.slane %v361_v43, %v4081_v33 }
 0x306   :  { %448 = vmatprep.mubr.f32.mxu1 %v3837_v10 }
 0x307   :  { %v312_v42 = vadd.f32 %v2882_v36, %v304_v41 }
 0x309   :  { %449 = vmatmul.mubr.f32.gmra.mrb[2].mxu1 %v312_v42  ;;  %3134 = vmatmul.mubr.f32.vlgmr.msra.gmra.mrb[4].mxu0 %v312_v42 }
 0x30a   :  { %3138 = vmatprep.mubr.msk.f32.mxu1 %vm3838_vm4, %v3837_v10  ;;  %3173 = vmatprep.mubr.msk.f32.mxu0 %vm3838_vm4, %v3837_v10 }
 0x3d8   :  { %v444_v48 = vpop.f32.mrb[0].mxu1 }
 0x3d9   :  { %v4092_v49 = vadd.f32 %v444_v48, %v366_v45  ;;  %v446_v51 = vpop.f32.mrb[1].mxu1 }
 0x3da   :  { %v4096_v54 = vadd.f32 %v446_v51, %v370_v47 }
 0x3db   :  { %858 = vrot.lane.b32.xlu0 %v4092_v49, %s3839_s8 }
 0x3dc   :  { %v450_v55 = vpop.f32.mrb[2].mxu1  ;;  %v3135_v56 = vpop.f32.mrb[4].mxu0  ;;  %3137 = vmatpush3.xpose.msk.msra.mxu1 %vm532_vm5, %v4096_v54 }
 0x3dd   :  { %v4102_v57 = vadd.f32 %v3135_v56, %v374_v50  ;;  %v452_v58 = vpop.f32.mrb[3].mxu1  ;;  %v521_v59 = vpop.f32.mrb[5].mxu0  ;;  %3141 = vmatprep.subr.mxu1 %v3837_v10  ;;  %v4113_v62 = vadd.f32 %v450_v55, %v366_v45 }
 0x3de   :  { %v4105_v60 = vadd.f32 %v452_v58, %v370_v47  ;;  %v4116_v63 = vadd.f32 %v521_v59, %v374_v50 }
 0x3df   :  { %3139 = vmatmul.mubr.msk.f32.vlgmr.msra.gmra.mrb[4].mxu1 %vm532_vm5, %v4092_v49 }
 0x3e0   :  { %3142 = vmatpush3.xpose.msk.msra.mxu1 %vm532_vm5, %v4105_v60  ;;  %3143 = vmatprep.mubr.msk.f32.mxu1 %vm3838_vm4, %v3837_v10 }
 0x3e1   :  { %3146 = vmatprep.subr.mxu1 %v3837_v10 }
 0x3e3   :  { %3144 = vmatmul.mubr.msk.f32.vlgmr.msra.gmra.mrb[6].mxu1 %vm532_vm5, %v4113_v62 }
 0x3e4   :  { %3147 = vmatpush3.msra.mxu1 %v4116_v63  ;;  %3148 = vmatprep.mubr.msk.f32.mxu1 %vm3838_vm4, %v3837_v10 }
 0x3e5   :  { %3151 = vmatprep.subr.mxu1 %v3837_v10 }
 0x44d   :  { %v859_v34 = vpop.permute.xlu0 %858 }
 0x4b2   :  { %v605_v0 = vpop.f32.mrb[4].mxu1 }
 0x4b3   :  { %v685_v3 = vmul.f32 0.17677669, %v605_v0  ;;  %v3140_v4 = vpop.f32.mrb[5].mxu1 }
 0x4b5   :  { %v687_v5 = vadd.f32 %v685_v3, %v4127_v1 }
 0x4b6   :  { %v681_v6 = vpop.f32.mrb[6].mxu1 }
 0x4b7   :  { %v686_v8 = vmul.f32 0.17677669, %v681_v6  ;;  %v3145_v9 = vpop.f32.mrb[7].mxu1  ;;  %v690_v11 = vsel %vm689_vm6, %v687_v5, -inf }
 0x4b8   :  { %691 = vmax.xlane.f32.xlu1 %v690_v11 }
 0x4b9   :  { %v688_v12 = vadd.f32 %v686_v8, %v4133_v7 }
 0x4bb   :  { %v693_v13 = vsel %vm689_vm6, %v688_v12, -inf }
 0x4bc   :  { %694 = vmax.xlane.f32.xlu1 %v693_v13 }
 0x4cd   :  { %860 = vrot.lane.b32.xlu1 %v4096_v54, %s3839_s8 }
 0x545   :  { %v692_v14 = vpop.xlane.xlu1 %691 }
 0x546   :  { %v696_v15 = vsub.f32 %v687_v5, %v692_v14 }
 0x548   :  { %v698_v16 = vmul.f32 1.442695, %v696_v15 }
 0x549   :  { %v695_v19 = vpop.xlane.xlu1 %694 }
 0x54a   :  { %3588 = vpow2.f32 %v698_v16  ;;  %v697_v20 = vsub.f32 %v688_v12, %v695_v19 }
 0x54c   :  { %v700_v21 = vmul.f32 1.442695, %v697_v20 }
 0x54d   :  { %v861_v24 = vpop.permute.xlu1 %860 }
 0x54e   :  { %3590 = vpow2.f32 %v700_v21 }
 0x554   :  { %v3589_v17 = vpop.eup %3588 }
 0x555   :  { %v702_v18 = vsel %vm689_vm6, %v3589_v17, 0.0 }
 0x556   :  { %703 = vadd.xlane.f32.xlu1 %v702_v18 }
 0x558   :  { %v3591_v22 = vpop.eup %3590 }
 0x559   :  { %v705_v23 = vsel %vm689_vm6, %v3591_v22, 0.0 }
 0x567   :  { %938 = vrot.lane.b32.xlu1 %v4105_v60, %s3839_s8 }
 0x58b   :  { %706 = vadd.xlane.f32.xlu1 %v705_v23 }
 0x59c   :  { %936 = vrot.lane.b32.xlu1 %v4113_v62, %s3839_s8 }
 0x5e3   :  { %v704_v25 = vpop.xlane.xlu1 %703 }
 0x5e4   :  { %3592 = vrcp.f32 %v704_v25 }
 0x5e7   :  { %v939_v28 = vpop.permute.xlu1 %938 }
 0x5ee   :  { %v3593_v26 = vpop.eup %3592 }
 0x5ef   :  { %v709_v27 = vmul.f32 %v3593_v26, %v3589_v17 }
 0x5f1   :  { %3149 = vmatmul.mubr.msk.f32.vlgmr.msra.gmra.mrb[8].mxu1 %vm689_vm6, %v709_v27 }
 0x5f2   :  { %3152 = vmatpush3.msra.mxu1 %v4102_v57  ;;  %3153 = vmatprep.mubr.msk.f32.mxu1 %vm3838_vm4, %v3837_v10 }
 0x5f3   :  { %3156 = vmatprep.subr.mxu1 %v3837_v10 }
 0x618   :  { %v707_v30 = vpop.xlane.xlu1 %706 }
 0x619   :  { %3594 = vrcp.f32 %v707_v30 }
 0x61c   :  { %v937_v35 = vpop.permute.xlu1 %936 }
 0x623   :  { %v3595_v31 = vpop.eup %3594 }
 0x624   :  { %v711_v32 = vmul.f32 %v3595_v31, %v3591_v22 }
 0x626   :  { %3154 = vmatmul.mubr.msk.f32.vlgmr.msra.gmra.mrb[10].mxu1 %vm689_vm6, %v711_v32 }
 0x627   :  { %3157 = vmatpush3.xpose.msk.msra.mxu1 %vm532_vm5, %v861_v24  ;;  %3158 = vmatprep.mubr.msk.f32.mxu1 %vm3838_vm4, %v3837_v10 }
 0x628   :  { %3161 = vmatprep.subr.mxu1 %v3837_v10 }
 0x62a   :  { %3159 = vmatmul.mubr.msk.f32.vlgmr.msra.gmra.mrb[12].mxu1 %vm532_vm5, %v859_v34 }
 0x62b   :  { %3162 = vmatpush3.xpose.msk.msra.mxu1 %vm532_vm5, %v939_v28  ;;  %3163 = vmatprep.mubr.msk.f32.mxu1 %vm3838_vm4, %v3837_v10 }
 0x62c   :  { %3166 = vmatprep.subr.mxu1 %v3837_v10 }
 0x62e   :  { %3164 = vmatmul.mubr.msk.f32.vlgmr.msra.gmra.mrb[14].mxu1 %vm532_vm5, %v937_v35 }
 0x62f   :  { %3168 = vmatprep.mubr.msk.f32.mxu1 %vm3838_vm4, %v3837_v10 }
 0x6c4   :  { %v4164_v36 = vpop.f32.mrb[8].mxu1 }
 0x6c5   :  { %v3150_v37 = vpop.f32.mrb[9].mxu1 }
 0x6f9   :  { %v4166_v38 = vpop.f32.mrb[10].mxu1 }
 0x6fa   :  { %v3155_v39 = vpop.f32.mrb[11].mxu1 }
 0x6fd   :  { %v932_v40 = vpop.f32.mrb[12].mxu1 }
 0x6fe   :  { %v1014_v41 = vmul.f32 0.17677669, %v932_v40  ;;  %v3160_v42 = vpop.f32.mrb[13].mxu1 }
 0x700   :  { %v1016_v43 = vadd.f32 %v1014_v41, %v4127_v1 }
 0x701   :  { %v1010_v45 = vpop.f32.mrb[14].mxu1 }
 0x702   :  { %v1015_v47 = vmul.f32 0.17677669, %v1010_v45  ;;  %v3165_v48 = vpop.f32.mrb[15].mxu1  ;;  %v1018_v51 = vsel %vm689_vm6, %v1016_v43, -inf }
 0x703   :  { %1019 = vmax.xlane.f32.xlu1 %v1018_v51 }
 0x704   :  { %v1017_v50 = vadd.f32 %v1015_v47, %v4133_v7 }
 0x706   :  { %v1021_v55 = vsel %vm689_vm6, %v1017_v50, -inf }
 0x707   :  { %1022 = vmax.xlane.f32.xlu0 %v1021_v55 }
 0x714   :  { %1041 = vrot.lane.b32.xlu1 %v4116_v63, %s3839_s8 }
 0x718   :  { %1196 = vrot.lane.b32.xlu1 %v4096_v54, %s3840_s5 }
 0x71c   :  { %1274 = vrot.lane.b32.xlu1 %v4105_v60, %s3840_s5 }
 0x71d   :  { %1118 = vrot.lane.b32.xlu0 %v4102_v57, %s3839_s8 }
 0x790   :  { %v1020_v56 = vpop.xlane.xlu1 %1019 }
 0x791   :  { %v1024_v58 = vsub.f32 %v1016_v43, %v1020_v56 }
 0x793   :  { %v1026_v59 = vmul.f32 1.442695, %v1024_v58 }
 0x794   :  { %v1042_v0 = vpop.permute.xlu1 %1041  ;;  %v1023_v3 = vpop.xlane.xlu0 %1022 }
 0x795   :  { %3596 = vpow2.f32 %v1026_v59  ;;  %v1025_v4 = vsub.f32 %v1017_v50, %v1023_v3  ;;  %3167 = vmatpush3.msra.mxu1 %v1042_v0 }
 0x796   :  { %3176 = vmatprep.subr.mxu1 %v3837_v10 }
 0x797   :  { %v1028_v5 = vmul.f32 1.442695, %v1025_v4 }
 0x798   :  { %v1119_v6 = vpop.permute.xlu0 %1118  ;;  %v1197_v13 = vpop.permute.xlu1 %1196 }
 0x799   :  { %3598 = vpow2.f32 %v1028_v5  ;;  %3172 = vmatpush3.msra.mxu0 %v1119_v6 }
 0x79a   :  { %3181 = vmatprep.subr.mxu0 %v3837_v10 }
 0x79c   :  { %v1275_v14 = vpop.permute.xlu1 %1274 }
 0x79f   :  { %v3597_v8 = vpop.eup %3596 }
 0x7a0   :  { %v1030_v9 = vsel %vm689_vm6, %v3597_v8, 0.0 }
 0x7a1   :  { %1031 = vadd.xlane.f32.xlu1 %v1030_v9 }
 0x7a3   :  { %v3599_v11 = vpop.eup %3598 }
 0x7a4   :  { %v1033_v12 = vsel %vm689_vm6, %v3599_v11, 0.0 }
 0x7a5   :  { %1034 = vadd.xlane.f32.xlu0 %v1033_v12 }
 0x7b2   :  { %1272 = vrot.lane.b32.xlu1 %v4113_v62, %s3840_s5 }
 0x7bb   :  { %1194 = vrot.lane.b32.xlu0 %v4092_v49, %s3840_s5 }
 0x82e   :  { %v1032_v15 = vpop.xlane.xlu1 %1031 }
 0x82f   :  { %3600 = vrcp.f32 %v1032_v15 }
 0x832   :  { %v1035_v16 = vpop.xlane.xlu0 %1034  ;;  %v1273_v22 = vpop.permute.xlu1 %1272 }
 0x833   :  { %3602 = vrcp.f32 %v1035_v16 }
 0x836   :  { %v1195_v21 = vpop.permute.xlu0 %1194 }
 0x839   :  { %v3601_v17 = vpop.eup %3600 }
 0x83a   :  { %v1037_v18 = vmul.f32 %v3601_v17, %v3597_v8 }
 0x83c   :  { %3169 = vmatmul.mubr.msk.f32.vlgmr.msra.gmra.mrb[16].mxu1 %vm689_vm6, %v1037_v18 }
 0x83d   :  { %v3603_v19 = vpop.eup %3602  ;;  %3177 = vmatpush3.xpose.msk.msra.mxu1 %vm532_vm5, %v1197_v13  ;;  %3178 = vmatprep.mubr.msk.f32.mxu1 %vm3838_vm4, %v3837_v10 }
 0x83e   :  { %v1039_v20 = vmul.f32 %v3603_v19, %v3599_v11  ;;  %3186 = vmatprep.subr.mxu1 %v3837_v10 }
 0x840   :  { %3174 = vmatmul.mubr.msk.f32.vlgmr.msra.gmra.mrb[6].mxu0 %vm689_vm6, %v1039_v20  ;;  %3179 = vmatmul.mubr.msk.f32.vlgmr.msra.gmra.mrb[18].mxu1 %vm532_vm5, %v1195_v21 }
 0x841   :  { %3182 = vmatpush3.xpose.msk.msra.mxu0 %vm532_vm5, %v1275_v14  ;;  %3183 = vmatprep.mubr.msk.f32.mxu0 %vm3838_vm4, %v3837_v10 }
 0x842   :  { %3191 = vmatprep.subr.mxu0 %v3837_v10  ;;  %3188 = vmatprep.mubr.msk.f32.mxu1 %vm3838_vm4, %v3837_v10 }
 0x844   :  { %3184 = vmatmul.mubr.msk.f32.vlgmr.msra.gmra.mrb[8].mxu0 %vm532_vm5, %v1273_v22 }
 0x845   :  { %3193 = vmatprep.mubr.msk.f32.mxu0 %vm3838_vm4, %v3837_v10 }
 0x90f   :  { %v4204_v23 = vpop.f32.mrb[16].mxu1 }
 0x910   :  { %v3170_v24 = vpop.f32.mrb[17].mxu1 }
 0x913   :  { %v4206_v25 = vpop.f32.mrb[6].mxu0  ;;  %v1268_v26 = vpop.f32.mrb[18].mxu1 }
 0x914   :  { %v3568_v27 = vpack.i.bf16 %v4206_v25, %v4204_v23  ;;  %v1350_v28 = vmul.f32 0.17677669, %v1268_v26  ;;  %v3175_v30 = vpop.f32.mrb[7].mxu0  ;;  %v3180_v31 = vpop.f32.mrb[19].mxu1 }
 0x916   :  { %v1352_v32 = vadd.f32 %v1350_v28, %v4127_v1 }
 0x917   :  { %v1346_v34 = vpop.f32.mrb[8].mxu0 }
 0x918   :  { %v1351_v35 = vmul.f32 0.17677669, %v1346_v34  ;;  %v3185_v37 = vpop.f32.mrb[9].mxu0  ;;  %v1354_v39 = vsel %vm689_vm6, %v1352_v32, -inf }
 0x919   :  { %1355 = vmax.xlane.f32.xlu0 %v1354_v39 }
 0x91a   :  { %v1353_v40 = vadd.f32 %v1351_v35, %v4133_v7 }
 0x91c   :  { %v1357_v41 = vsel %vm689_vm6, %v1353_v40, -inf }
 0x91d   :  { %1358 = vmax.xlane.f32.xlu1 %v1357_v41 }
 0x92e   :  { %1376 = vrot.lane.b32.xlu1 %v4116_v63, %s3840_s5 }
 0x92f   :  { %1452 = vrot.lane.b32.xlu0 %v4102_v57, %s3840_s5 }
 0x932   :  { %1530 = vrot.lane.b32.xlu1 %v4096_v54, %s3831_s28 }
 0x936   :  { %1608 = vrot.lane.b32.xlu1 %v4105_v60, %s3831_s28 }
 0x93a   :  { %1606 = vrot.lane.b32.xlu1 %v4113_v62, %s3831_s28 }
 0x9a6   :  { %v1356_v42 = vpop.xlane.xlu0 %1355 }
 0x9a7   :  { %v1360_v43 = vsub.f32 %v1352_v32, %v1356_v42 }
 0x9a9   :  { %v1362_v45 = vmul.f32 1.442695, %v1360_v43 }
 0x9aa   :  { %v1359_v47 = vpop.xlane.xlu1 %1358  ;;  %v1453_v48 = vpop.permute.xlu0 %1452 }
 0x9ab   :  { %3604 = vpow2.f32 %v1362_v45  ;;  %v1361_v51 = vsub.f32 %v1353_v40, %v1359_v47  ;;  %3192 = vmatpush3.msra.mxu0 %v1453_v48  ;;  %v1895_v47 = vld [vmem:[%s4487_s9 + $0x8] sm:$0xff]  ;;  %v1896_v48 = vld [vmem:[%s4487_s9 + $0x10] sm:$0xff] }
 0x9ac   :  { %3201 = vmatprep.subr.mxu0 %v3837_v10 }
 0x9ad   :  { %v1364_v50 = vmul.f32 1.442695, %v1361_v51 }
 0x9ae   :  { %v1377_v55 = vpop.permute.xlu1 %1376 }
 0x9af   :  { %3606 = vpow2.f32 %v1364_v50  ;;  %3187 = vmatpush3.msra.mxu1 %v1377_v55  ;;  %v1897_v50 = vld [vmem:[%s4487_s9 + $0x18] sm:$0xff] }
 0x9b0   :  { %3196 = vmatprep.subr.mxu1 %v3837_v10  ;;  %v3351_v55 = vpack.c.bf16 %v1897_v50, %v1896_v48  ;;  %v2040_v48 = vld [vmem:[#allocation7 + $0x20] sm:$0xff]  ;;  %v2038_v50 = vld [vmem:[#allocation7 + $0x10] sm:$0xff] }
 0x9b2   :  { %v1531_v0 = vpop.permute.xlu1 %1530 }
 0x9b5   :  { %v3605_v54 = vpop.eup %3604 }
 0x9b6   :  { %v1366_v60 = vsel %vm689_vm6, %v3605_v54, 0.0  ;;  %v1609_v6 = vpop.permute.xlu1 %1608 }
 0x9b7   :  { %1367 = vadd.xlane.f32.xlu0 %v1366_v60  ;;  %v1899_v60 = vld [vmem:[%s4487_s9 + $0x28] sm:$0xff] }
 0x9b9   :  { %v3607_v62 = vpop.eup %3606 }
 0x9ba   :  { %v1369_v56 = vsel %vm689_vm6, %v3607_v62, 0.0  ;;  %v1607_v9 = vpop.permute.xlu1 %1606 }
 0x9bb   :  { %1370 = vadd.xlane.f32.xlu0 %v1369_v56  ;;  %v1900_v56 = vld [vmem:[%s4487_s9 + $0x30] sm:$0xff] }
 0x9d1   :  { %1528 = vrot.lane.b32.xlu0 %v4092_v49, %s3831_s28 }
 0xa44   :  { %v1368_v58 = vpop.xlane.xlu0 %1367 }
 0xa45   :  { %3608 = vrcp.f32 %v1368_v58  ;;  %v1901_v58 = vld [vmem:[%s4487_s9 + $0x38] sm:$0xff] }
 0xa48   :  { %v1371_v59 = vpop.xlane.xlu0 %1370 }
 0xa49   :  { %3610 = vrcp.f32 %v1371_v59  ;;  %v3359_v59 = vpack.c.bf16 %v1901_v58, %v1900_v56  ;;  %v2051_v56 = vld [vmem:[#allocation7 + $0x78] sm:$0xff] }
 0xa4c   :  { %v1529_v49 = vpop.permute.xlu0 %1528 }
 0xa4f   :  { %v3609_v3 = vpop.eup %3608 }
 0xa50   :  { %v1373_v4 = vmul.f32 %v3609_v3, %v3605_v54  ;;  %v1898_v54 = vld [vmem:[%s4487_s9 + $0x20] sm:$0xff]  ;;  %v1903_v3 = vld [vmem:[%s4487_s9 + $0x48] sm:$0xff] }
 0xa52   :  { %3189 = vmatmul.mubr.msk.f32.vlgmr.msra.gmra.mrb[20].mxu1 %vm689_vm6, %v1373_v4 }
 0xa53   :  { %v3611_v5 = vpop.eup %3610  ;;  %3197 = vmatpush3.xpose.msk.msra.mxu1 %vm532_vm5, %v1531_v0  ;;  %3198 = vmatprep.mubr.msk.f32.mxu1 %vm3838_vm4, %v3837_v10  ;;  %v1902_v0 = vld [vmem:[%s4487_s9 + $0x40] sm:$0xff] }
 0xa54   :  { %v1375_v8 = vmul.f32 %v3611_v5, %v3607_v62  ;;  %3206 = vmatprep.subr.mxu1 %v3837_v10  ;;  %v3355_v62 = vpack.c.bf16 %v1899_v60, %v1898_v54  ;;  %v3363_v4 = vpack.c.bf16 %v1903_v3, %v1902_v0  ;;  %v1904_v5 = vld [vmem:[%s4487_s9 + $0x50] sm:$0xff]  ;;  %v2049_v60 = vld [vmem:[#allocation7 + $0x68] sm:$0xff]  ;;  %v2044_v0 = vld [vmem:[#allocation7 + $0x40] sm:$0xff] }
 0xa55   :  { %v2048_v3 = vld [vmem:[#allocation7 + $0x60] sm:$0xff] }
 0xa56   :  { %3194 = vmatmul.mubr.msk.f32.vlgmr.msra.gmra.mrb[10].mxu0 %vm689_vm6, %v1375_v8  ;;  %3199 = vmatmul.mubr.msk.f32.vlgmr.msra.gmra.mrb[22].mxu1 %vm532_vm5, %v1529_v49  ;;  %v1906_v49 = vld [vmem:[%s4487_s9 + $0x60] sm:$0xff] }
 0xa57   :  { %3202 = vmatpush3.xpose.msk.msra.mxu0 %vm532_vm5, %v1609_v6  ;;  %3203 = vmatprep.mubr.msk.f32.mxu0 %vm3838_vm4, %v3837_v10  ;;  %v1905_v6 = vld [vmem:[%s4487_s9 + $0x58] sm:$0xff] }
 0xa58   :  { %3211 = vmatprep.subr.mxu0 %v3837_v10  ;;  %3208 = vmatprep.mubr.msk.f32.mxu1 %vm3838_vm4, %v3837_v10  ;;  %v3367_v8 = vpack.c.bf16 %v1905_v6, %v1904_v5  ;;  %v3385_v5 = vpack.c.bf16 %v2048_v3, %v2044_v0  ;;  %v2050_v6 = vld [vmem:[#allocation7 + $0x70] sm:$0xff]  ;;  %v2076_v3 = vld [vmem:[#allocation7 + $0x140] sm:$0xff] }
 0xa5a   :  { %3204 = vmatmul.mubr.msk.f32.vlgmr.msra.gmra.mrb[12].mxu0 %vm532_vm5, %v1607_v9  ;;  %v1907_v9 = vld [vmem:[%s4487_s9 + $0x68] sm:$0xff] }
 0xa5b   :  { %3213 = vmatprep.mubr.msk.f32.mxu0 %vm3838_vm4, %v3837_v10 }
 0xb25   :  { %v1448_v11 = vpop.f32.mrb[20].mxu1 }
 0xb26   :  { %v3190_v12 = vpop.f32.mrb[21].mxu1 }
 0xb27   :  { %v1908_v12 = vld [vmem:[%s4487_s9 + $0x70] sm:$0xff] }
 0xb29   :  { %v1524_v13 = vpop.f32.mrb[10].mxu0  ;;  %v1602_v14 = vpop.f32.mrb[22].mxu1 }
 0xb2a   :  { %v3573_v15 = vpack.i.bf16 %v1524_v13, %v1448_v11  ;;  %v1684_v16 = vmul.f32 0.17677669, %v1602_v14  ;;  %v3195_v17 = vpop.f32.mrb[11].mxu0  ;;  %v3200_v18 = vpop.f32.mrb[23].mxu1  ;;  %v3371_v11 = vpack.c.bf16 %v1907_v9, %v1906_v49  ;;  %v1909_v13 = vld [vmem:[%s4487_s9 + $0x78] sm:$0xff]  ;;  %v2057_v49 = vld [vmem:[#allocation7 + $0xa8] sm:$0xff] }
 0xb2b   :  { %v3375_v14 = vpack.c.bf16 %v1909_v13, %v1908_v12  ;;  %v2055_v12 = vld [vmem:[#allocation7 + $0x98] sm:$0xff] }
 0xb2c   :  { %v1686_v19 = vadd.f32 %v1684_v16, %v4127_v1  ;;  %v2059_v13 = vld [vmem:[#allocation7 + $0xb8] sm:$0xff] }
 0xb2d   :  { %v1680_v20 = vpop.f32.mrb[12].mxu0 }
 0xb2e   :  { %v1685_v21 = vmul.f32 0.17677669, %v1680_v20  ;;  %v3205_v22 = vpop.f32.mrb[13].mxu0  ;;  %v1688_v24 = vsel %vm689_vm6, %v1686_v19, -inf }
 0xb2f   :  { %1689 = vmax.xlane.f32.xlu0 %v1688_v24 }
 0xb30   :  { %v1687_v26 = vadd.f32 %v1685_v21, %v4133_v7 }
 0xb32   :  { %v1691_v28 = vsel %vm689_vm6, %v1687_v26, -inf }
 0xb33   :  { %1692 = vmax.xlane.f32.xlu1 %v1691_v28 }
 0xb44   :  { %1710 = vrot.lane.b32.xlu1 %v4116_v63, %s3831_s28 }
 0xb48   :  { %3569 = vrot.lane.b32.xlu1 %v3568_v27, %s3831_s28 }
 0xb4c   :  { %3574 = vrot.lane.b32.xlu1 %v3573_v15, %s3840_s5 }
 0xbbc   :  { %v1690_v1 = vpop.xlane.xlu0 %1689 }
 0xbbd   :  { %v1694_v30 = vsub.f32 %v1686_v19, %v1690_v1 }
 0xbbf   :  { %v1696_v31 = vmul.f32 1.442695, %v1694_v30 }
 0xbc0   :  { %v1693_v32 = vpop.xlane.xlu1 %1692 }
 0xbc1   :  { %3612 = vpow2.f32 %v1696_v31  ;;  %v1695_v34 = vsub.f32 %v1687_v26, %v1693_v32 }
 0xbc3   :  { %v1698_v7 = vmul.f32 1.442695, %v1695_v34 }
 0xbc4   :  { %v1711_v35 = vpop.permute.xlu1 %1710 }
 0xbc5   :  { %3614 = vpow2.f32 %v1698_v7  ;;  %3207 = vmatpush3.msra.mxu1 %v1711_v35 }
 0xbc8   :  { %v3570_v20 = vpop.permute.xlu1 %3569 }
 0xbc9   :  { %v3572_v22 = vunpack.i.h.bf16 %v3570_v20  ;;  %v3571_v24 = vunpack.i.l.bf16 %v3570_v20 }
 0xbcb   :  { %v3613_v37 = vpop.eup %3612  ;;  %v1887_v30 = vsel %vm532_vm5, %v4166_v38, %v3572_v22  ;;  %v1886_v34 = vsel %vm532_vm5, %v4164_v36, %v3571_v24 }
 0xbcc   :  { %v1700_v63 = vsel %vm689_vm6, %v3613_v37, 0.0  ;;  %v3575_v21 = vpop.permute.xlu1 %3574 }
 0xbcd   :  { %1701 = vadd.xlane.f32.xlu0 %v1700_v63  ;;  %v3577_v26 = vunpack.i.h.bf16 %v3575_v21  ;;  %v3576_v28 = vunpack.i.l.bf16 %v3575_v21 }
 0xbcf   :  { %v3615_v39 = vpop.eup %3614  ;;  %v1889_v7 = vsel %vm1888_vm7, %v1886_v34, %v3576_v28  ;;  %v1890_v35 = vsel %vm1888_vm7, %v1887_v30, %v3577_v26  ;;  %v2065_v34 = vld [vmem:[#allocation7 + $0xe8] sm:$0xff] }
 0xbd0   :  { %v1703_v23 = vsel %vm689_vm6, %v3615_v39, 0.0 }
 0xbd1   :  { %1704 = vadd.xlane.f32.xlu0 %v1703_v23  ;;  %v2907_v23 = vld [vmem:[%s4488_s10] ss:$0 sm:$0xff] }
 0xbe7   :  { %1786 = vrot.lane.b32.xlu0 %v4102_v57, %s3831_s28  ;;  %v1894_v57 = vld [vmem:[%s4487_s9] sm:$0xff] }
 0xbe8   :  { %v3347_v51 = vpack.c.bf16 %v1895_v47, %v1894_v57  ;;  %v2043_v57 = vld [vmem:[#allocation7 + $0x38] sm:$0xff]  ;;  %v2036_v47 = vld [vmem:[#allocation7] sm:$0xff] }
 0xbea   :  { %3348 = vmatprep.subr.bf16.mxu1 %v3347_v51 }
 0xc5a   :  { %v1702_v25 = vpop.xlane.xlu0 %1701 }
 0xc5b   :  { %3616 = vrcp.f32 %v1702_v25 }
 0xc5e   :  { %v1705_v27 = vpop.xlane.xlu0 %1704 }
 0xc5f   :  { %3618 = vrcp.f32 %v1705_v27 }
 0xc62   :  { %v1787_v40 = vpop.permute.xlu0 %1786 }
 0xc63   :  { %3212 = vmatpush3.msra.mxu0 %v1787_v40 }
 0xc65   :  { %v3617_v41 = vpop.eup %3616 }
 0xc66   :  { %v1707_v42 = vmul.f32 %v3617_v41, %v3613_v37  ;;  %v2037_v41 = vld [vmem:[#allocation7 + $0x8] sm:$0xff] }
 0xc68   :  { %3209 = vmatmul.mubr.msk.f32.vlgmr.msra.gmra.mrb[24].mxu1 %vm689_vm6, %v1707_v42  ;;  %v2041_v42 = vld [vmem:[#allocation7 + $0x28] sm:$0xff] }
 0xc69   :  { %v3619_v43 = vpop.eup %3618  ;;  %3350 = vmatpush3.bf16.msra.mxu1 %v3347_v51 }
 0xc6a   :  { %v1709_v45 = vmul.f32 %v3619_v43, %v3615_v39  ;;  %3352 = vmatprep.subr.bf16.mxu1 %v3351_v55  ;;  %v2039_v43 = vld [vmem:[#allocation7 + $0x18] sm:$0xff] }
 0xc6b   :  { %v3411_v51 = vpack.c.bf16 %v2043_v57, %v2039_v43  ;;  %v2073_v43 = vld [vmem:[#allocation7 + $0x128] sm:$0xff] }
 0xc6c   :  { %3214 = vmatmul.mubr.msk.f32.vlgmr.msra.gmra.mrb[14].mxu0 %vm689_vm6, %v1709_v45  ;;  %v3379_v45 = vpack.c.bf16 %v2041_v42, %v2037_v41  ;;  %v2069_v42 = vld [vmem:[#allocation7 + $0x108] sm:$0xff] }
 0xc6d   :  { %2186 = vmatprep.mubr.f32.mxu0 %v3837_v10  ;;  %3354 = vmatpush3.bf16.msra.mxu1 %v3351_v55  ;;  %v2042_v55 = vld [vmem:[#allocation7 + $0x30] sm:$0xff]  ;;  %v3395_v57 = vpack.c.bf16 %v2073_v43, %v2069_v42 }
 0xc6e   :  { %3356 = vmatprep.subr.bf16.mxu1 %v3355_v62  ;;  %3380 = vmatprep.subr.bf16.mxu0 %v3379_v45  ;;  %v3413_v54 = vpack.c.bf16 %v2042_v55, %v2038_v50  ;;  %v2071_v45 = vld [vmem:[#allocation7 + $0x118] sm:$0xff]  ;;  %v2070_v55 = vld [vmem:[#allocation7 + $0x110] sm:$0xff] }
 0xc71   :  { %3358 = vmatpush3.bf16.msra.mxu1 %v3355_v62  ;;  %v2047_v62 = vld [vmem:[#allocation7 + $0x58] sm:$0xff] }
 0xc72   :  { %3360 = vmatprep.subr.bf16.mxu1 %v3359_v59 }
 0xc75   :  { %3362 = vmatpush3.bf16.msra.mxu1 %v3359_v59  ;;  %v3415_v59 = vpack.c.bf16 %v2051_v56, %v2047_v62  ;;  %v2081_v62 = vld [vmem:[#allocation7 + $0x168] sm:$0xff]  ;;  %v2079_v56 = vld [vmem:[#allocation7 + $0x158] sm:$0xff] }
 0xc76   :  { %3364 = vmatprep.subr.bf16.mxu1 %v3363_v4 }
 0xc79   :  { %3366 = vmatpush3.bf16.msra.mxu1 %v3363_v4  ;;  %v2046_v4 = vld [vmem:[#allocation7 + $0x50] sm:$0xff] }
 0xc7a   :  { %3368 = vmatprep.subr.bf16.mxu1 %v3367_v8  ;;  %v3417_v9 = vpack.c.bf16 %v2050_v6, %v2046_v4  ;;  %v2080_v4 = vld [vmem:[#allocation7 + $0x160] sm:$0xff] }
 0xc7b   :  { %v3401_v6 = vpack.c.bf16 %v2080_v4, %v2076_v3  ;;  %v2380_v3 = vld [vmem:[#allocation8 + $0x100] sm:$0xff]  ;;  %v2381_v4 = vld [vmem:[#allocation8 + $0x108] sm:$0xff] }
 0xc7d   :  { %3370 = vmatpush3.bf16.msra.mxu1 %v3367_v8  ;;  %v2053_v8 = vld [vmem:[#allocation7 + $0x88] sm:$0xff] }
 0xc7e   :  { %3372 = vmatprep.subr.bf16.mxu1 %v3371_v11 }
 0xc81   :  { %3374 = vmatpush3.bf16.msra.mxu1 %v3371_v11  ;;  %v3387_v11 = vpack.c.bf16 %v2057_v49, %v2053_v8  ;;  %v2082_v8 = vld [vmem:[#allocation7 + $0x170] sm:$0xff]  ;;  %v2085_v49 = vld [vmem:[#allocation7 + $0x188] sm:$0xff] }
 0xc82   :  { %3376 = vmatprep.subr.bf16.mxu1 %v3375_v14 }
 0xc85   :  { %3378 = vmatpush3.bf16.msra.mxu1 %v3375_v14  ;;  %v2052_v14 = vld [vmem:[#allocation7 + $0x80] sm:$0xff] }
 0xc86   :  { %3412 = vmatprep.subr.bf16.mxu1 %v3411_v51  ;;  %v2072_v51 = vld [vmem:[#allocation7 + $0x120] sm:$0xff] }
 0xd3b   :  { %v1782_v15 = vpop.f32.mrb[24].mxu1 }
 0xd3c   :  { %v3210_v16 = vpop.f32.mrb[25].mxu1 }
 0xd3d   :  { %v2056_v16 = vld [vmem:[#allocation7 + $0xa0] sm:$0xff] }
 0xd3f   :  { %v1858_v17 = vpop.f32.mrb[14].mxu0 }
 0xd40   :  { %v3578_v18 = vpack.i.bf16 %v1858_v17, %v1782_v15  ;;  %v3215_v19 = vpop.f32.mrb[15].mxu0  ;;  %v3419_v15 = vpack.c.bf16 %v2059_v13, %v2055_v12  ;;  %v2054_v17 = vld [vmem:[#allocation7 + $0x90] sm:$0xff]  ;;  %v2087_v13 = vld [vmem:[#allocation7 + $0x198] sm:$0xff] }
 0xd41   :  { %v3389_v19 = vpack.c.bf16 %v2056_v16, %v2052_v14  ;;  %v2091_v14 = vld [vmem:[#allocation7 + $0x1b8] sm:$0xff] }
 0xd42   :  { %3579 = vrot.lane.b32.xlu0 %v3578_v18, %s3839_s8  ;;  %v2058_v18 = vld [vmem:[#allocation7 + $0xb0] sm:$0xff]  ;;  %v3435_v16 = vpack.c.bf16 %v2091_v14, %v2087_v13  ;;  %v2351_v13 = vld [vmem:[#allocation8 + $0x18] sm:$0xff] }
 0xd43   :  { %v3421_v20 = vpack.c.bf16 %v2058_v18, %v2054_v17  ;;  %v2088_v17 = vld [vmem:[#allocation7 + $0x1a0] sm:$0xff]  ;;  %v2086_v18 = vld [vmem:[#allocation7 + $0x190] sm:$0xff] }
 0xdb4   :  { %v3580_v1 = vpop.permute.xlu0 %3579 }
 0xdb5   :  { %v3582_v31 = vunpack.i.h.bf16 %v3580_v1  ;;  %v3581_v32 = vunpack.i.l.bf16 %v3580_v1 }
 0xdb7   :  { %v1892_v37 = vsel %vm1891_vm8, %v1889_v7, %v3581_v32  ;;  %v1893_v63 = vsel %vm1891_vm8, %v1890_v35, %v3582_v31  ;;  %v2061_v32 = vld [vmem:[#allocation7 + $0xc8] sm:$0xff]  ;;  %v2063_v7 = vld [vmem:[#allocation7 + $0xd8] sm:$0xff] }
 0xdb8   :  { %3248 = vmatprep.mubr.f32.mxu1 %v1892_v37  ;;  %v3391_v35 = vpack.c.bf16 %v2065_v34, %v2061_v32  ;;  %v2067_v37 = vld [vmem:[#allocation7 + $0xf8] sm:$0xff]  ;;  %v2092_v32 = vld [vmem:[#allocation7 + $0x1c0] sm:$0xff] }
 0xdb9   :  { %3249 = vmatmul.mubr.f32.vlgmr.msra.gmra.mrb[26].mxu1 %v1893_v63  ;;  %v2060_v63 = vld [vmem:[#allocation7 + $0xc0] sm:$0xff] }
 0xdba   :  { %2263 = vmatprep.mubr.f32.mxu1 %v3837_v10  ;;  %3414 = vmatpush1.bf16.msra.mxu1 %v3413_v54  ;;  %v2077_v54 = vld [vmem:[#allocation7 + $0x148] sm:$0xff]  ;;  %v2096_v34 = vld [vmem:[#allocation7 + $0x1e0] sm:$0xff] }
 0xdbb   :  { %3416 = vmatprep.subr.bf16.mxu1 %v3415_v59  ;;  %v3399_v59 = vpack.c.bf16 %v2081_v62, %v2077_v54  ;;  %v2364_v54 = vld [vmem:[#allocation8 + $0x80] sm:$0xff]  ;;  %v2397_v62 = vld [vmem:[#allocation8 + $0x188] sm:$0xff] }
 0xdbe   :  { %3418 = vmatpush1.bf16.msra.mxu1 %v3417_v9  ;;  %v2089_v9 = vld [vmem:[#allocation7 + $0x1a8] sm:$0xff] }
 0xdbf   :  { %3420 = vmatprep.subr.bf16.mxu1 %v3419_v15  ;;  %v3403_v12 = vpack.c.bf16 %v2089_v9, %v2085_v49  ;;  %v2084_v15 = vld [vmem:[#allocation7 + $0x180] sm:$0xff]  ;;  %v2398_v49 = vld [vmem:[#allocation8 + $0x190] sm:$0xff] }
 0xdc2   :  { %3422 = vmatpush1.bf16.msra.mxu1 %v3421_v20  ;;  %v3405_v20 = vpack.c.bf16 %v2088_v17, %v2084_v15  ;;  %v2383_v17 = vld [vmem:[#allocation8 + $0x118] sm:$0xff] }
 0xe8c   :  { %v3250_v39 = vpop.f32.mrb[26].mxu1 }
 0xe8d   :  { %v1986_v38 = vadd.f32 %v3250_v39, %v4048_v2  ;;  %v1976_v25 = vpop.f32.mrb[27].mxu1  ;;  %v3381_v2 = vpack.c.bf16 %v2040_v48, %v2036_v47  ;;  %v2064_v39 = vld [vmem:[#allocation7 + $0xe0] sm:$0xff]  ;;  %v2075_v47 = vld [vmem:[#allocation7 + $0x138] sm:$0xff] }
 0xe8e   :  { %v1985_v27 = vadd.f32 %v1976_v25, %v4042_v61  ;;  %v2045_v61 = vld [vmem:[#allocation7 + $0x48] sm:$0xff]  ;;  %v2062_v25 = vld [vmem:[#allocation7 + $0xd0] sm:$0xff]  ;;  %v2068_v48 = vld [vmem:[#allocation7 + $0x100] sm:$0xff] }
 0xe8f   :  { %v4323_v40 = vadd.f32 %v2907_v23, %v1986_v38  ;;  %3382 = vmatpush1.bf16.msra.mxu0 %v3381_v2  ;;  %v3383_v58 = vpack.c.bf16 %v2049_v60, %v2045_v61  ;;  %v3393_v38 = vpack.c.bf16 %v2064_v39, %v2060_v63  ;;  %v3427_v2 = vpack.c.bf16 %v2075_v47, %v2071_v45  ;;  %v2074_v61 = vld [vmem:[#allocation7 + $0x130] sm:$0xff] }
 0xe90   :  { %v4325_v36 = vadd.f32 %v2907_v23, %v1985_v27  ;;  %v3423_v23 = vpack.c.bf16 %v2067_v37, %v2063_v7  ;;  %v2066_v27 = vld [vmem:[#allocation7 + $0xf0] sm:$0xff]  ;;  %v3397_v50 = vpack.c.bf16 %v2072_v51, %v2068_v48  ;;  %v3429_v60 = vpack.c.bf16 %v2074_v61, %v2070_v55  ;;  %v2909_v51 = vld [vmem:[%s4490_s12] ss:$0 sm:$0xff] }
 0xe91   :  { %2000 = vadd.xlane.f32.xlu0 %v4323_v40  ;;  %3384 = vmatprep.subr.bf16.mxu0 %v3383_v58  ;;  %v3425_v41 = vpack.c.bf16 %v2066_v27, %v2062_v25  ;;  %v2083_v58 = vld [vmem:[#allocation7 + $0x178] sm:$0xff]  ;;  %v2098_v37 = vld [vmem:[#allocation7 + $0x1f0] sm:$0xff]  ;;  %v3409_v63 = vpack.c.bf16 %v2096_v34, %v2092_v32  ;;  %v2384_v34 = vld [vmem:[#allocation8 + $0x120] sm:$0xff] }
 0xe92   :  { %1998 = vadd.xlane.f32.xlu1 %v4325_v36  ;;  %3424 = vmatprep.subr.bf16.mxu1 %v3423_v23  ;;  %v3431_v0 = vpack.c.bf16 %v2083_v58, %v2079_v56  ;;  %v2348_v56 = vld [vmem:[#allocation8] sm:$0xff]  ;;  %v2349_v58 = vld [vmem:[#allocation8 + $0x8] sm:$0xff] }
 0xe93   :  { %3386 = vmatpush1.bf16.msra.mxu0 %v3385_v5  ;;  %3426 = vmatpush1.bf16.msra.mxu1 %v3425_v41  ;;  %v2078_v5 = vld [vmem:[#allocation7 + $0x150] sm:$0xff] }
 0xe94   :  { %3388 = vmatprep.subr.bf16.mxu0 %v3387_v11  ;;  %3428 = vmatprep.subr.bf16.mxu1 %v3427_v2  ;;  %v3433_v11 = vpack.c.bf16 %v2082_v8, %v2078_v5  ;;  %v3477_v5 = vpack.c.bf16 %v2381_v4, %v2380_v3  ;;  %v2367_v8 = vld [vmem:[#allocation8 + $0x98] sm:$0xff]  ;;  %v2358_v4 = vld [vmem:[#allocation8 + $0x50] sm:$0xff] }
 0xe95   :  { %v2407_v3 = vld [vmem:[#allocation8 + $0x1d8] sm:$0xff] }
 0xe97   :  { %3390 = vmatpush1.bf16.msra.mxu0 %v3389_v19  ;;  %3430 = vmatpush1.bf16.msra.mxu1 %v3429_v60  ;;  %v2090_v19 = vld [vmem:[#allocation7 + $0x1b0] sm:$0xff]  ;;  %v2396_v60 = vld [vmem:[#allocation8 + $0x180] sm:$0xff] }
 0xe98   :  { %3392 = vmatprep.subr.bf16.mxu0 %v3391_v35  ;;  %3432 = vmatprep.subr.bf16.mxu1 %v3431_v0  ;;  %v2094_v35 = vld [vmem:[#allocation7 + $0x1d0] sm:$0xff]  ;;  %v3445_v0 = vpack.c.bf16 %v2349_v58, %v2348_v56  ;;  %v2375_v58 = vld [vmem:[#allocation8 + $0xd8] sm:$0xff] }
 0xe99   :  { %v3441_v39 = vpack.c.bf16 %v2098_v37, %v2094_v35  ;;  %v2370_v37 = vld [vmem:[#allocation8 + $0xb0] sm:$0xff] }
 0xe9a   :  { %v2374_v56 = vld [vmem:[#allocation8 + $0xd0] sm:$0xff] }
 0xe9b   :  { %3394 = vmatpush1.bf16.msra.mxu0 %v3393_v38  ;;  %3434 = vmatpush1.bf16.msra.mxu1 %v3433_v11  ;;  %v2399_v11 = vld [vmem:[#allocation8 + $0x198] sm:$0xff] }
 0xe9c   :  { %3396 = vmatprep.subr.bf16.mxu0 %v3395_v57  ;;  %3436 = vmatprep.subr.bf16.mxu1 %v3435_v16  ;;  %v2908_v57 = vld [vmem:[%s4489_s11] ss:$0 sm:$0xff]  ;;  %v3479_v14 = vpack.c.bf16 %v2399_v11, %v2398_v49  ;;  %v2382_v16 = vld [vmem:[#allocation8 + $0x110] sm:$0xff] }
 0xe9d   :  { %v2390_v49 = vld [vmem:[#allocation8 + $0x150] sm:$0xff] }
 0xe9f   :  { %3398 = vmatpush1.bf16.msra.mxu0 %v3397_v50 }
 0xea0   :  { %3400 = vmatprep.subr.bf16.mxu0 %v3399_v59  ;;  %v3475_v59 = vpack.c.bf16 %v2397_v62, %v2396_v60  ;;  %v2388_v60 = vld [vmem:[#allocation8 + $0x140] sm:$0xff] }
 0xea3   :  { %3402 = vmatpush1.bf16.msra.mxu0 %v3401_v6  ;;  %v2366_v6 = vld [vmem:[#allocation8 + $0x90] sm:$0xff] }
 0xea4   :  { %3404 = vmatprep.subr.bf16.mxu0 %v3403_v12  ;;  %v3447_v9 = vpack.c.bf16 %v2367_v8, %v2366_v6  ;;  %v2350_v12 = vld [vmem:[#allocation8 + $0x10] sm:$0xff] }
 0xea5   :  { %v3449_v15 = vpack.c.bf16 %v2351_v13, %v2350_v12  ;;  %v2376_v12 = vld [vmem:[#allocation8 + $0xe0] sm:$0xff]  ;;  %v2377_v13 = vld [vmem:[#allocation8 + $0xe8] sm:$0xff] }
 0xea7   :  { %3406 = vmatpush1.bf16.msra.mxu0 %v3405_v20  ;;  %v2369_v20 = vld [vmem:[#allocation8 + $0xa8] sm:$0xff] }
 0xf1e   :  { %v2001_v21 = vpop.xlane.xlu0 %2000 }
 0xf1f   :  { %v2003_v22 = vmul.f32 0.0078125, %v2001_v21  ;;  %v1999_v24 = vpop.xlane.xlu1 %1998  ;;  %v2093_v21 = vld [vmem:[#allocation7 + $0x1c8] sm:$0xff] }
 0xf20   :  { %v2002_v26 = vmul.f32 0.0078125, %v1999_v24  ;;  %v2095_v24 = vld [vmem:[#allocation7 + $0x1d8] sm:$0xff] }
 0xf21   :  { %v4330_v28 = vsub.f32 %v4323_v40, %v2003_v22  ;;  %v2097_v22 = vld [vmem:[#allocation7 + $0x1e8] sm:$0xff] }
 0xf22   :  { %v4333_v1 = vsub.f32 %v4325_v36, %v2002_v26  ;;  %v3437_v26 = vpack.c.bf16 %v2090_v19, %v2086_v18  ;;  %v3481_v18 = vpack.c.bf16 %v2383_v17, %v2382_v16  ;;  %v2368_v19 = vld [vmem:[#allocation8 + $0xa0] sm:$0xff]  ;;  %v2409_v16 = vld [vmem:[#allocation8 + $0x1e8] sm:$0xff] }
 0xf23   :  { %v2007_v30 = vmul.f32 %v4330_v28, %v4330_v28  ;;  %v2360_v17 = vld [vmem:[#allocation8 + $0x60] sm:$0xff] }
 0xf24   :  { %v2006_v31 = vmul.f32 %v4333_v1, %v4333_v1  ;;  %3438 = vmatpush1.bf16.msra.mxu1 %v3437_v26  ;;  %v2352_v26 = vld [vmem:[#allocation8 + $0x20] sm:$0xff] }
 0xf25   :  { %2010 = vadd.xlane.f32.xlu1 %v2007_v30  ;;  %v3407_v30 = vpack.c.bf16 %v2097_v22, %v2093_v21  ;;  %v2400_v21 = vld [vmem:[#allocation8 + $0x1a0] sm:$0xff]  ;;  %v3451_v22 = vpack.c.bf16 %v2369_v20, %v2368_v19 }
 0xf26   :  { %2008 = vadd.xlane.f32.xlu0 %v2006_v31  ;;  %v2099_v31 = vld [vmem:[#allocation7 + $0x1f8] sm:$0xff] }
 0xf27   :  { %v3439_v7 = vpack.c.bf16 %v2099_v31, %v2095_v24  ;;  %3408 = vmatprep.subr.bf16.mxu0 %v3407_v30  ;;  %v2401_v24 = vld [vmem:[#allocation8 + $0x1a8] sm:$0xff] }
 0xf28   :  { %3410 = vmatpush1.bf16.msra.mxu0 %v3409_v63  ;;  %v2353_v30 = vld [vmem:[#allocation8 + $0x28] sm:$0xff]  ;;  %v3483_v31 = vpack.c.bf16 %v2401_v24, %v2400_v21  ;;  %v2371_v63 = vld [vmem:[#allocation8 + $0xb8] sm:$0xff]  ;;  %v2392_v21 = vld [vmem:[#allocation8 + $0x160] sm:$0xff] }
 0xf29   :  { %3440 = vmatprep.subr.bf16.mxu1 %v3439_v7  ;;  %v3453_v32 = vpack.c.bf16 %v2353_v30, %v2352_v26  ;;  %v2385_v7 = vld [vmem:[#allocation8 + $0x128] sm:$0xff]  ;;  %v2378_v26 = vld [vmem:[#allocation8 + $0xf0] sm:$0xff]  ;;  %v2379_v30 = vld [vmem:[#allocation8 + $0xf8] sm:$0xff] }
 0xf2a   :  { %3442 = vmatpush1.bf16.msra.mxu1 %v3441_v39  ;;  %v3485_v35 = vpack.c.bf16 %v2385_v7, %v2384_v34  ;;  %v2402_v39 = vld [vmem:[#allocation8 + $0x1b0] sm:$0xff]  ;;  %v2411_v34 = vld [vmem:[#allocation8 + $0x1f8] sm:$0xff] }
 0xf2b   :  { %3476 = vmatprep.subr.bf16.mxu1 %v3475_v59  ;;  %v2406_v59 = vld [vmem:[#allocation8 + $0x1d0] sm:$0xff] }
 0xf2c   :  { %v3495_v6 = vpack.c.bf16 %v2407_v3, %v2406_v59  ;;  %v2362_v7 = vld [vmem:[#allocation8 + $0x70] sm:$0xff] }
 0xfb2   :  { %v2011_v23 = vpop.xlane.xlu1 %2010 }
 0xfb3   :  { %v2013_v38 = vmul.f32 0.0078125, %v2011_v23  ;;  %v2009_v25 = vpop.xlane.xlu0 %2008  ;;  %v3455_v23 = vpack.c.bf16 %v2371_v63, %v2370_v37 }
 0xfb4   :  { %v2012_v27 = vmul.f32 0.0078125, %v2009_v25  ;;  %v2354_v25 = vld [vmem:[#allocation8 + $0x30] sm:$0xff] }
 0xfb5   :  { %v2015_v41 = vadd.f32 1e-05, %v2013_v38  ;;  %v2403_v38 = vld [vmem:[#allocation8 + $0x1b8] sm:$0xff] }
 0xfb6   :  { %v2014_v42 = vadd.f32 1e-05, %v2012_v27  ;;  %v2355_v27 = vld [vmem:[#allocation8 + $0x38] sm:$0xff] }
 0xfb7   :  { %3620 = vrsqrt.f32 %v2015_v41  ;;  %v3487_v41 = vpack.c.bf16 %v2403_v38, %v2402_v39  ;;  %v2394_v39 = vld [vmem:[#allocation8 + $0x170] sm:$0xff] }
 0xfb8   :  { %3622 = vrsqrt.f32 %v2014_v42  ;;  %v3457_v42 = vpack.c.bf16 %v2355_v27, %v2354_v25  ;;  %v2100_v25 = vld [vmem:[%s4492_s14] sm:$0xf]  ;;  %v2116_v27 = vsub.s32 3, %v4078_v29 }
 0xfc1   :  { %v3621_v43 = vpop.eup %3620 }
 0xfc2   :  { %v3623_v45 = vpop.eup %3622  ;;  %v2019_v48 = vmul.f32 %v3621_v43, %v4330_v28  ;;  %v2386_v43 = vld [vmem:[#allocation8 + $0x130] sm:$0xff] }
 0xfc3   :  { %v2018_v47 = vmul.f32 %v3623_v45, %v4333_v1  ;;  %v2365_v1 = vld [vmem:[#allocation8 + $0x88] sm:$0xff]  ;;  %v2387_v45 = vld [vmem:[#allocation8 + $0x138] sm:$0xff] }
 0xfc4   :  { %v2027_v55 = vmul.f32 %v2908_v57, %v2019_v48  ;;  %v3443_v28 = vpack.c.bf16 %v2365_v1, %v2364_v54  ;;  %v2373_v48 = vld [vmem:[#allocation8 + $0xc8] sm:$0xff] }
 0xfc5   :  { %v2026_v2 = vmul.f32 %v2908_v57, %v2018_v47  ;;  %v3489_v57 = vpack.c.bf16 %v2387_v45, %v2386_v43  ;;  %v2372_v47 = vld [vmem:[#allocation8 + $0xc0] sm:$0xff]  ;;  %v2109_v43 = vrot.slane %v2100_v25, %v4087_v44  ;;  %v2117_v45 = vrot.slane %v2100_v25, %v2116_v27 }
 0xfc6   :  { %v2035_v61 = vadd.f32 %v2909_v51, %v2027_v55  ;;  %3444 = vmatprep.subr.bf16.mxu0 %v3443_v28  ;;  %v2356_v55 = vld [vmem:[#allocation8 + $0x40] sm:$0xff]  ;;  %v2389_v28 = vld [vmem:[#allocation8 + $0x148] sm:$0xff] }
 0xfc7   :  { %v2034_v50 = vadd.f32 %v2909_v51, %v2026_v2  ;;  %v2404_v51 = vld [vmem:[#allocation8 + $0x1c0] sm:$0xff]  ;;  %v3459_v2 = vpack.c.bf16 %v2373_v48, %v2372_v47  ;;  %v3493_v62 = vpack.c.bf16 %v2389_v28, %v2388_v60 }
 0xfc9   :  { %2187 = vmatmul.mubr.f32.vlgmr.msra.gmra.mrb[16].mxu0 %v2034_v50  ;;  %2264 = vmatmul.mubr.f32.vlgmr.msra.gmra.mrb[28].mxu1 %v2034_v50  ;;  %v2405_v50 = vld [vmem:[#allocation8 + $0x1c8] sm:$0xff] }
 0xfca   :  { %2192 = vmatprep.mubr.f32.mxu0 %v3837_v10  ;;  %2269 = vmatprep.mubr.f32.mxu1 %v3837_v10  ;;  %v3491_v54 = vpack.c.bf16 %v2405_v50, %v2404_v51 }
 0xfcb   :  { %3446 = vmatpush3.bf16.msra.mxu0 %v3445_v0  ;;  %3478 = vmatpush3.bf16.msra.mxu1 %v3477_v5  ;;  %v3463_v0 = vpack.c.bf16 %v2375_v58, %v2374_v56  ;;  %v2359_v5 = vld [vmem:[#allocation8 + $0x58] sm:$0xff] }
 0xfcc   :  { %3448 = vmatprep.subr.bf16.mxu0 %v3447_v9  ;;  %3480 = vmatprep.subr.bf16.mxu1 %v3479_v14  ;;  %v3465_v8 = vpack.c.bf16 %v2359_v5, %v2358_v4  ;;  %v2391_v9 = vld [vmem:[#allocation8 + $0x158] sm:$0xff]  ;;  %v2408_v14 = vld [vmem:[#allocation8 + $0x1e0] sm:$0xff] }
 0xfcd   :  { %2193 = vmatmul.mubr.f32.gmra.mrb[18].mxu0 %v2035_v61  ;;  %2270 = vmatmul.mubr.f32.gmra.mrb[30].mxu1 %v2035_v61  ;;  %v2357_v61 = vld [vmem:[#allocation8 + $0x48] sm:$0xff]  ;;  %v3497_v11 = vpack.c.bf16 %v2391_v9, %v2390_v49  ;;  %v3499_v19 = vpack.c.bf16 %v2409_v16, %v2408_v14 }
 0xfce   :  { %v3461_v1 = vpack.c.bf16 %v2357_v61, %v2356_v55 }
 0xfcf   :  { %3450 = vmatpush3.bf16.msra.mxu0 %v3449_v15  ;;  %3482 = vmatpush3.bf16.msra.mxu1 %v3481_v18  ;;  %v3467_v15 = vpack.c.bf16 %v2377_v13, %v2376_v12  ;;  %v2361_v18 = vld [vmem:[#allocation8 + $0x68] sm:$0xff] }
 0xfd0   :  { %3452 = vmatprep.subr.bf16.mxu0 %v3451_v22  ;;  %3484 = vmatprep.subr.bf16.mxu1 %v3483_v31  ;;  %v3469_v20 = vpack.c.bf16 %v2361_v18, %v2360_v17  ;;  %v2393_v22 = vld [vmem:[#allocation8 + $0x168] sm:$0xff]  ;;  %v2410_v31 = vld [vmem:[#allocation8 + $0x1f0] sm:$0xff] }
 0xfd1   :  { %v3501_v24 = vpack.c.bf16 %v2393_v22, %v2392_v21  ;;  %v3503_v37 = vpack.c.bf16 %v2411_v34, %v2410_v31 }
 0xfd3   :  { %3454 = vmatpush3.bf16.msra.mxu0 %v3453_v32  ;;  %3486 = vmatpush3.bf16.msra.mxu1 %v3485_v35  ;;  %v3471_v32 = vpack.c.bf16 %v2379_v30, %v2378_v26  ;;  %v2363_v35 = vld [vmem:[#allocation8 + $0x78] sm:$0xff] }
 0xfd4   :  { %3456 = vmatprep.subr.bf16.mxu0 %v3455_v23  ;;  %3488 = vmatprep.subr.bf16.mxu1 %v3487_v41  ;;  %v3473_v63 = vpack.c.bf16 %v2363_v35, %v2362_v7  ;;  %v2395_v23 = vld [vmem:[#allocation8 + $0x178] sm:$0xff]  ;;  %v2105_v41 = vrot.slane %v2100_v25, %v4081_v33 }
 0xfd5   :  { %v3505_v38 = vpack.c.bf16 %v2395_v23, %v2394_v39 }
 0xfd7   :  { %3458 = vmatpush3.bf16.msra.mxu0 %v3457_v42  ;;  %3490 = vmatpush3.bf16.msra.mxu1 %v3489_v57  ;;  %v2113_v42 = vrot.slane %v2100_v25, %v373_v46 }
 0xfd8   :  { %3460 = vmatprep.subr.bf16.mxu0 %v3459_v2  ;;  %3492 = vmatprep.subr.bf16.mxu1 %v3491_v54 }
 0xfdb   :  { %3462 = vmatpush3.bf16.msra.mxu0 %v3461_v1  ;;  %3494 = vmatpush3.bf16.msra.mxu1 %v3493_v62 }
 0xfdc   :  { %3464 = vmatprep.subr.bf16.mxu0 %v3463_v0  ;;  %3496 = vmatprep.subr.bf16.mxu1 %v3495_v6 }
 0xfdf   :  { %3466 = vmatpush3.bf16.msra.mxu0 %v3465_v8  ;;  %3498 = vmatpush3.bf16.msra.mxu1 %v3497_v11 }
 0xfe0   :  { %3468 = vmatprep.subr.bf16.mxu0 %v3467_v15  ;;  %3500 = vmatprep.subr.bf16.mxu1 %v3499_v19 }
 0xfe3   :  { %3470 = vmatpush3.bf16.msra.mxu0 %v3469_v20  ;;  %3502 = vmatpush3.bf16.msra.mxu1 %v3501_v24 }
 0xfe4   :  { %3472 = vmatprep.subr.bf16.mxu0 %v3471_v32  ;;  %3504 = vmatprep.subr.bf16.mxu1 %v3503_v37 }
 0xfe7   :  { %3474 = vmatpush3.bf16.msra.mxu0 %v3473_v63  ;;  %3506 = vmatpush3.bf16.msra.mxu1 %v3505_v38 }
0x109c   :  { %v2188_v57 = vpop.f32.mrb[16].mxu0  ;;  %v2265_v47 = vpop.f32.mrb[28].mxu1 }
0x109d   :  { %v4357_v48 = vadd.f32 %v2188_v57, %v2105_v41  ;;  %v4359_v51 = vadd.f32 %v2265_v47, %v2113_v42  ;;  %v2190_v2 = vpop.f32.mrb[17].mxu0  ;;  %v2267_v50 = vpop.f32.mrb[29].mxu1 }
0x109e   :  { %v4361_v55 = vadd.f32 %v2190_v2, %v2109_v43  ;;  %v4363_v61 = vadd.f32 %v2267_v50, %v2117_v45 }
0x109f   :  { %v2276_v54 = vmul.f32 %v4357_v48, %v4357_v48  ;;  %v2278_v29 = vmul.f32 %v4359_v51, %v4359_v51 }
0x10a0   :  { %v2277_v46 = vmul.f32 %v4361_v55, %v4361_v55  ;;  %v2279_v1 = vmul.f32 %v4363_v61, %v4363_v61  ;;  %v2194_v60 = vpop.f32.mrb[18].mxu0  ;;  %v2271_v28 = vpop.f32.mrb[30].mxu1 }
0x10a1   :  { %v2284_v62 = vmul.f32 %v2276_v54, %v4357_v48  ;;  %v2286_v56 = vmul.f32 %v2278_v29, %v4359_v51  ;;  %v4375_v58 = vadd.f32 %v2194_v60, %v2105_v41  ;;  %v4377_v59 = vadd.f32 %v2271_v28, %v2113_v42  ;;  %v2196_v0 = vpop.f32.mrb[19].mxu0  ;;  %v2273_v3 = vpop.f32.mrb[31].mxu1 }
0x10a2   :  { %v2285_v4 = vmul.f32 %v2277_v46, %v4361_v55  ;;  %v2287_v5 = vmul.f32 %v2279_v1, %v4363_v61  ;;  %v4381_v6 = vadd.f32 %v2196_v0, %v2109_v43  ;;  %v4383_v8 = vadd.f32 %v2273_v3, %v2117_v45 }
0x10a3   :  { %v2292_v49 = vmul.f32 0.044715, %v2284_v62  ;;  %v2294_v9 = vmul.f32 0.044715, %v2286_v56  ;;  %v2280_v11 = vmul.f32 %v4375_v58, %v4375_v58  ;;  %v2282_v12 = vmul.f32 %v4377_v59, %v4377_v59 }
0x10a4   :  { %v2293_v13 = vmul.f32 0.044715, %v2285_v4  ;;  %v2295_v14 = vmul.f32 0.044715, %v2287_v5  ;;  %v2281_v15 = vmul.f32 %v4381_v6, %v4381_v6  ;;  %v2283_v16 = vmul.f32 %v4383_v8, %v4383_v8 }
0x10a5   :  { %v2300_v17 = vadd.f32 %v2292_v49, %v4357_v48  ;;  %v2302_v18 = vadd.f32 %v2294_v9, %v4359_v51  ;;  %v2288_v19 = vmul.f32 %v2280_v11, %v4375_v58  ;;  %v2290_v20 = vmul.f32 %v2282_v12, %v4377_v59 }
0x10a6   :  { %v2301_v21 = vadd.f32 %v2293_v13, %v4361_v55  ;;  %v2303_v22 = vadd.f32 %v2295_v14, %v4363_v61  ;;  %v2289_v24 = vmul.f32 %v2281_v15, %v4381_v6  ;;  %v2291_v26 = vmul.f32 %v2283_v16, %v4383_v8 }
0x10a7   :  { %v2308_v30 = vmul.f32 0.7978846, %v2300_v17  ;;  %v2310_v31 = vmul.f32 0.7978846, %v2302_v18  ;;  %v2296_v32 = vmul.f32 0.044715, %v2288_v19 }
0x10a8   :  { %v2309_v34 = vmul.f32 0.7978846, %v2301_v21  ;;  %v2311_v7 = vmul.f32 0.7978846, %v2303_v22  ;;  %v2298_v35 = vmul.f32 0.044715, %v2290_v20 }
0x10a9   :  { %3624 = vtanh.f32 %v2308_v30  ;;  %v2304_v37 = vadd.f32 %v2296_v32, %v4375_v58  ;;  %v2297_v63 = vmul.f32 0.044715, %v2289_v24  ;;  %v2299_v39 = vmul.f32 0.044715, %v2291_v26 }
0x10aa   :  { %3626 = vtanh.f32 %v2310_v31  ;;  %v2306_v23 = vadd.f32 %v2298_v35, %v4377_v59 }
0x10ab   :  { %v2312_v38 = vmul.f32 0.7978846, %v2304_v37  ;;  %v2305_v25 = vadd.f32 %v2297_v63, %v4381_v6  ;;  %v2307_v27 = vadd.f32 %v2299_v39, %v4383_v8  ;;  %3628 = vtanh.f32 %v2309_v34 }
0x10ac   :  { %v2314_v41 = vmul.f32 0.7978846, %v2306_v23  ;;  %3630 = vtanh.f32 %v2311_v7 }
0x10ad   :  { %v2313_v42 = vmul.f32 0.7978846, %v2305_v25  ;;  %v2315_v43 = vmul.f32 0.7978846, %v2307_v27  ;;  %3632 = vtanh.f32 %v2312_v38  ;;  %v2614_v38 = vld [vmem:[#allocation10 + $0x8] sm:$0xff]  ;;  %v2616_v25 = vld [vmem:[#allocation10 + $0x18] sm:$0xff] }
0x10ae   :  { %3634 = vtanh.f32 %v2314_v41  ;;  %v2613_v27 = vld [vmem:[#allocation10] sm:$0xff]  ;;  %v3507_v41 = vpack.c.bf16 %v2616_v25, %v2614_v38 }
0x10af   :  { %3636 = vtanh.f32 %v2313_v42  ;;  %v2615_v42 = vld [vmem:[#allocation10 + $0x10] sm:$0xff] }
0x10b0   :  { %3638 = vtanh.f32 %v2315_v43  ;;  %v2618_v43 = vld [vmem:[#allocation10 + $0x28] sm:$0xff]  ;;  %3508 = vmatprep.subr.bf16.mxu0 %v3507_v41 }
0x10b3   :  { %v3625_v45 = vpop.eup %3624 }
0x10b4   :  { %v3627_v57 = vpop.eup %3626  ;;  %v2324_v47 = vadd.f32 1.0, %v3625_v45  ;;  %v2620_v45 = vld [vmem:[#allocation10 + $0x38] sm:$0xff] }
0x10b5   :  { %v3629_v2 = vpop.eup %3628  ;;  %v2326_v50 = vadd.f32 1.0, %v3627_v57  ;;  %v3509_v57 = vpack.c.bf16 %v2615_v42, %v2613_v27  ;;  %v2911_v42 = vld [vmem:[%s4495_s17] ss:$0 sm:$0xff] }
0x10b6   :  { %v3631_v54 = vpop.eup %3630  ;;  %v2325_v29 = vadd.f32 1.0, %v3629_v2  ;;  %v2332_v1 = vmul.f32 0.5, %v2324_v47  ;;  %v3511_v47 = vpack.c.bf16 %v2620_v45, %v2618_v43  ;;  %v2617_v2 = vld [vmem:[#allocation10 + $0x20] sm:$0xff] }
0x10b7   :  { %v3633_v46 = vpop.eup %3632  ;;  %v2327_v60 = vadd.f32 1.0, %v3631_v54  ;;  %v2334_v62 = vmul.f32 0.5, %v2326_v50  ;;  %v2619_v50 = vld [vmem:[#allocation10 + $0x30] sm:$0xff]  ;;  %v2622_v54 = vld [vmem:[#allocation10 + $0x48] sm:$0xff]  ;;  %v2912_v45 = vld [vmem:[%s4496_s18] ss:$0 sm:$0xff] }
0x10b8   :  { %v3635_v28 = vpop.eup %3634  ;;  %v2333_v56 = vmul.f32 0.5, %v2325_v29  ;;  %v2328_v0 = vadd.f32 1.0, %v3633_v46  ;;  %v2340_v12 = vmul.f32 %v2332_v1, %v4357_v48  ;;  %v3513_v29 = vpack.c.bf16 %v2619_v50, %v2617_v2  ;;  %v2621_v46 = vld [vmem:[#allocation10 + $0x40] sm:$0xff]  ;;  %v2623_v1 = vld [vmem:[#allocation10 + $0x50] sm:$0xff] }
0x10b9   :  { %v3637_v3 = vpop.eup %3636  ;;  %v2335_v4 = vmul.f32 0.5, %v2327_v60  ;;  %v2330_v5 = vadd.f32 1.0, %v3635_v28  ;;  %v2342_v16 = vmul.f32 %v2334_v62, %v4359_v51  ;;  %v3517_v60 = vpack.c.bf16 %v2623_v1, %v2621_v46 }
0x10ba   :  { %v3639_v49 = vpop.eup %3638  ;;  %v2341_v9 = vmul.f32 %v2333_v56, %v4361_v55  ;;  %v2329_v11 = vadd.f32 1.0, %v3637_v3  ;;  %v2336_v15 = vmul.f32 0.5, %v2328_v0 }
0x10bb   :  { %v2343_v13 = vmul.f32 %v2335_v4, %v4363_v61  ;;  %v2331_v14 = vadd.f32 1.0, %v3639_v49  ;;  %v2338_v18 = vmul.f32 0.5, %v2330_v5 }
0x10bc   :  { %2476 = vmatprep.mubr.f32.mxu0 %v2341_v9  ;;  %v2337_v17 = vmul.f32 0.5, %v2329_v11  ;;  %v2344_v21 = vmul.f32 %v2336_v15, %v4375_v58  ;;  %v2626_v9 = vld [vmem:[#allocation10 + $0x68] sm:$0xff]  ;;  %v2628_v11 = vld [vmem:[#allocation10 + $0x78] sm:$0xff] }
0x10bd   :  { %2551 = vmatprep.mubr.f32.mxu1 %v2343_v13  ;;  %2477 = vmatmul.mubr.f32.vlgmr.msra.gmra.mrb[20].mxu0 %v2340_v12  ;;  %v2339_v19 = vmul.f32 0.5, %v2331_v14  ;;  %v2346_v48 = vmul.f32 %v2338_v18, %v4377_v59  ;;  %v2910_v59 = vld [vmem:[%s4494_s16] ss:$0 sm:$0xff]  ;;  %v3519_v12 = vpack.c.bf16 %v2628_v11, %v2626_v9  ;;  %v2627_v14 = vld [vmem:[#allocation10 + $0x70] sm:$0xff] }
0x10be   :  { %2552 = vmatmul.mubr.f32.vlgmr.msra.gmra.mrb[32].mxu1 %v2342_v16  ;;  %v2345_v20 = vmul.f32 %v2337_v17, %v4381_v6  ;;  %3510 = vmatpush1.bf16.msra.mxu0 %v3509_v57  ;;  %v2625_v13 = vld [vmem:[#allocation10 + $0x60] sm:$0xff]  ;;  %v2630_v16 = vld [vmem:[#allocation10 + $0x88] sm:$0xff]  ;;  %v2632_v17 = vld [vmem:[#allocation10 + $0x98] sm:$0xff] }
0x10bf   :  { %v2347_v55 = vmul.f32 %v2339_v19, %v4383_v8  ;;  %3512 = vmatprep.subr.bf16.mxu0 %v3511_v47  ;;  %v3521_v15 = vpack.c.bf16 %v2627_v14, %v2625_v13  ;;  %v3523_v18 = vpack.c.bf16 %v2632_v17, %v2630_v16  ;;  %v2629_v19 = vld [vmem:[#allocation10 + $0x80] sm:$0xff] }
0x10c0   :  { %2481 = vmatprep.mubr.f32.mxu0 %v2345_v20  ;;  %v2631_v20 = vld [vmem:[#allocation10 + $0x90] sm:$0xff] }
0x10c1   :  { %2556 = vmatprep.mubr.f32.mxu1 %v2347_v55  ;;  %2482 = vmatmul.mubr.f32.gmra.mrb[22].mxu0 %v2344_v21  ;;  %v3525_v55 = vpack.c.bf16 %v2631_v20, %v2629_v19  ;;  %v2634_v21 = vld [vmem:[#allocation10 + $0xa8] sm:$0xff] }
0x10c2   :  { %2557 = vmatmul.mubr.f32.gmra.mrb[34].mxu1 %v2346_v48  ;;  %2721 = vmatprep.mubr.f32.mxu0 %v3837_v10  ;;  %v2636_v48 = vld [vmem:[#allocation10 + $0xb8] sm:$0xff] }
0x10c3   :  { %3514 = vmatpush1.bf16.msra.mxu0 %v3513_v29  ;;  %v2645_v29 = vld [vmem:[%s4498_s20] sm:$0x3]  ;;  %s4521_s20 = sld [smem:[#allocation20_spill]] }
0x10c4   :  { %v2654_v46 = vrot.slane %v2645_v29, %v4087_v44 }
0x10c9   :  { %v2738_v44 = vld [vmem:[%s4521_s20] sm:$0xff] }
0x10ca   :  { %vm2798_vm13 = vcmp.ge.s32.totalorder %v2738_v44, 0 }
0x1190   :  { %v3057_v51 = vpop.f32.mrb[20].mxu0 }
0x1191   :  { %v3095_v61 = vpop.f32.mrb[32].mxu1  ;;  %v3058_v22 = vpop.f32.mrb[21].mxu0 }
0x1192   :  { %v3059_v24 = vadd.f32 %v3058_v22, %v3057_v51  ;;  %v3096_v26 = vpop.f32.mrb[33].mxu1  ;;  %v3527_v51 = vpack.c.bf16 %v2636_v48, %v2634_v21  ;;  %v2635_v22 = vld [vmem:[#allocation10 + $0xb0] sm:$0xff] }
0x1193   :  { %v3097_v30 = vadd.f32 %v3096_v26, %v3095_v61  ;;  %v2633_v61 = vld [vmem:[#allocation10 + $0xa0] sm:$0xff]  ;;  %v2638_v26 = vld [vmem:[#allocation10 + $0xc8] sm:$0xff] }
0x1194   :  { %v3060_v31 = vpop.f32.mrb[22].mxu0 }
0x1195   :  { %v2554_v6 = vadd.f32 %v3097_v30, %v3059_v24  ;;  %v3098_v32 = vpop.f32.mrb[34].mxu1  ;;  %v3061_v8 = vpop.f32.mrb[23].mxu0  ;;  %v3529_v24 = vpack.c.bf16 %v2635_v22, %v2633_v61  ;;  %v2640_v30 = vld [vmem:[#allocation10 + $0xd8] sm:$0xff] }
0x1196   :  { %v3062_v34 = vadd.f32 %v3061_v8, %v3060_v31  ;;  %v3099_v58 = vpop.f32.mrb[35].mxu1  ;;  %v3531_v31 = vpack.c.bf16 %v2640_v30, %v2638_v26 }
0x1197   :  { %v3100_v7 = vadd.f32 %v3099_v58, %v3098_v32  ;;  %v2562_v35 = vadd.f32 %v2554_v6, %v4325_v36  ;;  %v2624_v36 = vld [vmem:[#allocation10 + $0x58] sm:$0xff]  ;;  %v2637_v6 = vld [vmem:[#allocation10 + $0xc0] sm:$0xff]  ;;  %v2639_v32 = vld [vmem:[#allocation10 + $0xd0] sm:$0xff] }
0x1198   :  { %v3533_v8 = vpack.c.bf16 %v2639_v32, %v2637_v6  ;;  %v2644_v58 = vld [vmem:[#allocation10 + $0xf8] sm:$0xff] }
0x1199   :  { %v2559_v37 = vadd.f32 %v3100_v7, %v3062_v34  ;;  %v2571_v63 = vadd.f32 %v2910_v59, %v2562_v35  ;;  %v2642_v34 = vld [vmem:[#allocation10 + $0xe8] sm:$0xff]  ;;  %v2641_v7 = vld [vmem:[#allocation10 + $0xe0] sm:$0xff]  ;;  %v2643_v35 = vld [vmem:[#allocation10 + $0xf0] sm:$0xff] }
0x119b   :  { %2575 = vadd.xlane.f32.xlu0 %v2571_v63  ;;  %v2563_v39 = vadd.f32 %v2559_v37, %v4323_v40  ;;  %v3515_v40 = vpack.c.bf16 %v2624_v36, %v2622_v54  ;;  %v3537_v37 = vpack.c.bf16 %v2643_v35, %v2641_v7  ;;  %v2917_v7 = vsel %vm2798_vm13, 1.0, %v3837_v10 }
0x119c   :  { %v2821_v35 = vsel %vm2808_vm15, %v2917_v7, 0.0 }
0x119d   :  { %v2572_v23 = vadd.f32 %v2910_v59, %v2563_v39  ;;  %3516 = vmatprep.subr.bf16.mxu0 %v3515_v40  ;;  %v3535_v59 = vpack.c.bf16 %v2644_v58, %v2642_v34  ;;  %v2650_v40 = vrot.slane %v2645_v29, %v4081_v33  ;;  %v2739_v33 = vld [vmem:[%s4521_s20 + $0x8] sm:$0xff] }
0x119e   :  { %3518 = vmatpush1.bf16.msra.mxu0 %v3517_v60  ;;  %vm2799_vm14 = vcmp.ge.s32.totalorder %v2739_v33, 0 }
0x119f   :  { %2577 = vadd.xlane.f32.xlu1 %v2572_v23  ;;  %3520 = vmatprep.subr.bf16.mxu0 %v3519_v12 }
0x11a2   :  { %3522 = vmatpush1.bf16.msra.mxu0 %v3521_v15 }
0x11a3   :  { %3524 = vmatprep.subr.bf16.mxu0 %v3523_v18 }
0x11a6   :  { %3526 = vmatpush1.bf16.msra.mxu0 %v3525_v55 }
0x11a7   :  { %3528 = vmatprep.subr.bf16.mxu0 %v3527_v51 }
0x11aa   :  { %3530 = vmatpush1.bf16.msra.mxu0 %v3529_v24 }
0x11ab   :  { %3532 = vmatprep.subr.bf16.mxu0 %v3531_v31 }
0x11ae   :  { %3534 = vmatpush1.bf16.msra.mxu0 %v3533_v8 }
0x11af   :  { %3536 = vmatprep.subr.bf16.mxu0 %v3535_v59 }
0x11b2   :  { %3538 = vmatpush1.bf16.msra.mxu0 %v3537_v37 }
0x1228   :  { %v2576_v28 = vpop.xlane.xlu0 %2575 }
0x1229   :  { %v2579_v62 = vmul.f32 0.0078125, %v2576_v28 }
0x122b   :  { %v2581_v56 = vsub.f32 %v2571_v63, %v2579_v62 }
0x122c   :  { %v2578_v0 = vpop.xlane.xlu1 %2577 }
0x122d   :  { %v2580_v3 = vmul.f32 0.0078125, %v2578_v0  ;;  %v2583_v4 = vmul.f32 %v2581_v56, %v2581_v56 }
0x122f   :  { %v2582_v5 = vsub.f32 %v2572_v23, %v2580_v3  ;;  %2585 = vadd.xlane.f32.xlu0 %v2583_v4 }
0x1231   :  { %v2584_v49 = vmul.f32 %v2582_v5, %v2582_v5 }
0x1233   :  { %2587 = vadd.xlane.f32.xlu1 %v2584_v49 }
0x12bc   :  { %v2586_v63 = vpop.xlane.xlu0 %2585 }
0x12bd   :  { %v2589_v39 = vmul.f32 0.0078125, %v2586_v63 }
0x12bf   :  { %v2591_v23 = vadd.f32 1e-05, %v2589_v39 }
0x12c0   :  { %v2588_v38 = vpop.xlane.xlu1 %2587 }
0x12c1   :  { %3640 = vrsqrt.f32 %v2591_v23  ;;  %v2590_v25 = vmul.f32 0.0078125, %v2588_v38 }
0x12c3   :  { %v2592_v27 = vadd.f32 1e-05, %v2590_v25 }
0x12c5   :  { %3642 = vrsqrt.f32 %v2592_v27 }
0x12cb   :  { %v3641_v41 = vpop.eup %3640 }
0x12cc   :  { %v2595_v43 = vmul.f32 %v3641_v41, %v2581_v56 }
0x12ce   :  { %v2603_v57 = vmul.f32 %v2911_v42, %v2595_v43 }
0x12cf   :  { %v3643_v47 = vpop.eup %3642 }
0x12d0   :  { %v2611_v2 = vadd.f32 %v2912_v45, %v2603_v57  ;;  %v2596_v50 = vmul.f32 %v3643_v47, %v2582_v5 }
0x12d2   :  { %2722 = vmatmul.mubr.f32.vlgmr.msra.gmra.mrb[24].mxu0 %v2611_v2  ;;  %v2604_v54 = vmul.f32 %v2911_v42, %v2596_v50 }
0x12d3   :  { %2727 = vmatprep.mubr.f32.mxu0 %v3837_v10 }
0x12d4   :  { %v2612_v36 = vadd.f32 %v2912_v45, %v2604_v54 }
0x12d6   :  { %2728 = vmatmul.mubr.f32.gmra.mrb[26].mxu0 %v2612_v36 }
0x13a5   :  { %v2723_v1 = vpop.f32.mrb[24].mxu0 }
0x13a6   :  { %v2724_v60 = vadd.f32 %v2723_v1, %v2650_v40  ;;  %v2725_v28 = vpop.f32.mrb[25].mxu0 }
0x13a7   :  { %v2726_v62 = vadd.f32 %v2725_v28, %v2654_v46 }
0x13a8   :  { %2734 = vst [vmem:[#allocation11] sm:$0xff] %v2724_v60 }
0x13a9   :  { %2735 = vst [vmem:[#allocation11 + $0x8] sm:$0xff] %v2726_v62  ;;  %v2729_v56 = vpop.f32.mrb[26].mxu0  ;;  %v2740_v0 = vmax.f32 %v2724_v60, %v2726_v62 }
0x13aa   :  { %v2730_v3 = vadd.f32 %v2729_v56, %v2650_v40  ;;  %v2731_v4 = vpop.f32.mrb[27].mxu0 }
0x13ab   :  { %v2732_v5 = vadd.f32 %v2731_v4, %v2654_v46  ;;  %2741 = vmax.xlane.f32.xlu0 %v2740_v0 }
0x13ac   :  { %2736 = vst [vmem:[#allocation11 + $0x10] sm:$0xff] %v2730_v3 }
0x13ad   :  { %2737 = vst [vmem:[#allocation11 + $0x18] sm:$0xff] %v2732_v5  ;;  %v2743_v49 = vmax.f32 %v2730_v3, %v2732_v5 }
0x13af   :  { %2744 = vmax.xlane.f32.xlu1 %v2743_v49 }
0x13c0   :  { %2774 = vperm.xlu1 %3583, %v2739_v33  }
0x13c1   :  { %2771 = vperm.xlu0 %3567, %v2738_v44  }
0x1438   :  { %v2742_v9 = vpop.xlane.xlu0 %2741 }
0x1439   :  { %v2746_v11 = vsub.f32 %v2724_v60, %v2742_v9  ;;  %v2747_v12 = vsub.f32 %v2726_v62, %v2742_v9 }
0x143b   :  { %v2750_v13 = vmul.f32 1.442695, %v2746_v11  ;;  %v2752_v14 = vmul.f32 1.442695, %v2747_v12 }
0x143c   :  { %v2745_v15 = vpop.xlane.xlu1 %2744 }
0x143d   :  { %3644 = vpow2.f32 %v2750_v13  ;;  %v2748_v16 = vsub.f32 %v2730_v3, %v2745_v15  ;;  %v2749_v17 = vsub.f32 %v2732_v5, %v2745_v15 }
0x143e   :  { %3646 = vpow2.f32 %v2752_v14 }
0x143f   :  { %v2754_v18 = vmul.f32 1.442695, %v2748_v16  ;;  %v2756_v19 = vmul.f32 1.442695, %v2749_v17 }
0x1440   :  { %v2775_v20 = vpop.permute.xlu1 %2774  ;;  %v2772_v55 = vpop.permute.xlu0 %2771 }
0x1441   :  { %3648 = vpow2.f32 %v2754_v18  ;;  %vm2778_vm9 = vcmp.eq.s32.totalorder %v4030_v52, %v2775_v20  ;;  %vm2779_vm10 = vcmp.eq.s32.totalorder %v4033_v53, %v2775_v20  ;;  %vm2776_vm11 = vcmp.eq.s32.totalorder %v4030_v52, %v2772_v55 }
0x1442   :  { %3650 = vpow2.f32 %v2756_v19  ;;  %v2915_v21 = vsel %vm2778_vm9, 1.0, %v3837_v10  ;;  %v2916_v48 = vsel %vm2779_vm10, 1.0, %v3837_v10  ;;  %vm2777_vm12 = vcmp.eq.s32.totalorder %v4033_v53, %v2772_v55 }
0x1443   :  { %v2790_v24 = vmul.f32 %v2915_v21, %v2730_v3  ;;  %v2791_v26 = vmul.f32 %v2916_v48, %v2732_v5  ;;  %v2913_v30 = vsel %vm2776_vm11, 1.0, %v3837_v10  ;;  %v2914_v31 = vsel %vm2777_vm12, 1.0, %v3837_v10 }
0x1444   :  { %v2788_v58 = vmul.f32 %v2913_v30, %v2724_v60  ;;  %v2789_v59 = vmul.f32 %v2914_v31, %v2726_v62  ;;  %v2918_v53 = vsel %vm2799_vm14, 1.0, %v3837_v10 }
0x1445   :  { %v2795_v34 = vadd.f32 %v2791_v26, %v2790_v24  ;;  %v2822_v37 = vsel %vm2808_vm15, %v2918_v53, 0.0 }
0x1446   :  { %v2792_v52 = vadd.f32 %v2789_v59, %v2788_v58  ;;  %v2823_v63 = vadd.f32 %v2822_v37, %v2821_v35 }
0x1447   :  { %v3645_v51 = vpop.eup %3644 }
0x1448   :  { %v3647_v61 = vpop.eup %3646 }
0x1449   :  { %v2758_v22 = vadd.f32 %v3647_v61, %v3645_v51 }
0x144b   :  { %v3649_v6 = vpop.eup %3648  ;;  %2759 = vadd.xlane.f32.xlu1 %v2758_v22 }
0x144c   :  { %v3651_v32 = vpop.eup %3650 }
0x144d   :  { %v2761_v8 = vadd.f32 %v3651_v32, %v3649_v6 }
0x144f   :  { %2762 = vadd.xlane.f32.xlu0 %v2761_v8  ;;  %2796 = vadd.xlane.f32.xlu1 %v2795_v34 }
0x1453   :  { %2793 = vadd.xlane.f32.xlu0 %v2792_v52  ;;  %2824 = vadd.xlane.f32.xlu1 %v2823_v63 }
0x14d8   :  { %v2760_v39 = vpop.xlane.xlu1 %2759 }
0x14d9   :  { %3652 = vlog2.f32 %v2760_v39 }
0x14dc   :  { %v2763_v23 = vpop.xlane.xlu0 %2762  ;;  %v2797_v10 = vpop.xlane.xlu1 %2796 }
0x14dd   :  { %3654 = vlog2.f32 %v2763_v23 }
0x14e0   :  { %v2794_v42 = vpop.xlane.xlu0 %2793  ;;  %v2825_v40 = vpop.xlane.xlu1 %2824 }
0x14e1   :  { %v2826_v46 = vrot.slane %v2825_v40, 4 }
0x14e3   :  { %v3653_v38 = vpop.eup %3652  ;;  %v2827_v1 = vadd.f32 %v2826_v46, %v2825_v40 }
0x14e4   :  { %v2765_v25 = vmul.f32 0.6931472, %v3653_v38 }
0x14e5   :  { %v2828_v60 = vrot.slane %v2827_v1, 2 }
0x14e6   :  { %v2768_v27 = vadd.f32 %v2765_v25, %v2742_v9 }
0x14e7   :  { %v3655_v41 = vpop.eup %3654 }
0x14e8   :  { %v2767_v43 = vmul.f32 0.6931472, %v3655_v41  ;;  %v2804_v45 = vsub.f32 %v2768_v27, %v2794_v42 }
0x14ea   :  { %v2769_v57 = vadd.f32 %v2767_v43, %v2745_v15  ;;  %v2806_v2 = vmul.f32 %v2917_v7, %v2804_v45 }
0x14ec   :  { %v2805_v47 = vsub.f32 %v2769_v57, %v2797_v10  ;;  %v2809_v54 = vsel %vm2808_vm15, %v2806_v2, 0.0 }
0x14ee   :  { %v2807_v50 = vmul.f32 %v2918_v53, %v2805_v47 }
0x14f0   :  { %v2810_v36 = vsel %vm2808_vm15, %v2807_v50, 0.0 }
0x14f1   :  { %v2811_v29 = vadd.f32 %v2810_v36, %v2809_v54 }
0x14f3   :  { %2812 = vadd.xlane.f32.xlu0 %v2811_v29 }
0x1580   :  { %v2813_v28 = vpop.xlane.xlu0 %2812 }
0x1581   :  { %v2814_v62 = vrot.slane %v2813_v28, 4 }
0x1583   :  { %v2815_v56 = vadd.f32 %v2814_v62, %v2813_v28 }
0x1584   :  { %3779 = shalt.err (!%p3776_p2)
}
0x1585   :  { %s3780_s30 = scalar_lea.hbm %s4499_s21, 512 }
0x1586   :  { %p3781_p3 = scmp.ne.s32.totalorder %s4499_s21, %s3780_s30  ;;  %p3784_p4 = scmp.lt.u32.totalorder %s3780_s30, %s4499_s21 }
0x1588   :  { %p3786_p5 = pnand %p3784_p4, %p3781_p3 }
0x158a   :  { %3789 = shalt.err (!%p3786_p5)
}
0x158b   :  { %2851 = dma.vmem_to_hbm [thread:$0]  %s2846_s29, 512, %s4499_s21, [#allocation4], %s3833_s13, %s3833_s13, %s3834_s7   ;;  %v2829_v0 = vadd.f32 %v2828_v60, %v2827_v1  ;;  %v2816_v3 = vrot.slane %v2815_v56, 2 }
0x158c   :  { %s3842_s12 = smov 1.0   ;;  %s3843_s5 = smov [#allocation12]  }
0x158d   :  { %v2817_v4 = vadd.f32 %v2816_v3, %v2815_v56  ;;  %v2830_v5 = vrot.slane %v2829_v0, 1  ;;  %s2858_s16 = sshll.u32 %s3843_s5, 4  ;;  %s2859_s16 = int_to_ptr.vmem [resolvable:$true] %s2858_s16 }
0x158e   :  { %s3790_s7 = scalar_lea.vmem %s2859_s16, 16  ;;  %s3794_s15 = scalar_lea.vmem %s2859_s16, 32 }
0x158f   :  { %v2818_v49 = vrot.slane %v2817_v4, 1  ;;  %v2831_v44 = vadd.f32 %v2830_v5, %v2829_v0  ;;  %p3791_p6 = scmp.ne.s32.totalorder %s2859_s16, %s3790_s7  ;;  %p3795_p7 = scmp.lt.s32.totalorder %s2859_s16, %s2859_s16 }
0x1590   :  { %p3796_p8 = scmp.lt.s32.totalorder %s3794_s15, %s3790_s7 }
0x1591   :  { %v2819_v33 = vadd.f32 %v2818_v49, %v2817_v4 }
0x1592   :  { %p3797_p9 = por %p3796_p8, %p3795_p7 }
0x1593   :  { %3539 = vpush %v2819_v33 }
0x1594   :  { %3541 = vpush %v2831_v44  ;;  %p3798_p10 = pnand %p3797_p9, %p3791_p6 }
0x15c4   :  { %s3540_s19 = spop %3539 }
0x15c5   :  { %s3542_s11 = spop %3541 }
0x15c6   :  { %s2833_s14 = smax.f32 %s3842_s12, %s3542_s11 }
0x15c7   :  { %v2834_v9 = vstv %s2833_s14 }
0x15c8   :  { %3656 = vrcp.f32 %v2834_v9 }
0x15d2   :  { %v3657_v11 = vpop.eup %3656 }
0x15d3   :  { %3543 = vpush %v3657_v11 }
0x1604   :  { %s3544_s21 = spop %3543 }
0x1605   :  { %s2837_s13 = smul.f32 %s3544_s21, %s3540_s19 }
0x1607   :  { %v2838_v12 = vstv %s2837_s13 }
0x1608   :  { %2839 = vst [vmem:[#allocation12] sm:$0x1] %v2838_v12 }
0x1609   :  { %3801 = shalt.err (!%p3798_p10)
}
0x160a   :  { %s4522_s24 = sld [smem:[#allocation26_spill]] }
0x1610   :  { %s3802_s25 = scalar_lea.hbm %s4522_s24, 16 }
0x1611   :  { %p3803_p11 = scmp.ne.s32.totalorder %s4522_s24, %s3802_s25  ;;  %p3806_p12 = scmp.lt.u32.totalorder %s3802_s25, %s4522_s24 }
0x1613   :  { %p3808_p13 = pnand %p3806_p12, %p3803_p11 }
0x1615   :  { %3811 = shalt.err (!%p3808_p13)
}
0x1616   :  { %2861 = dma.vmem_to_hbm [thread:$0]  %s2859_s16, 16, %s4522_s24, [#allocation13]  }
0x1617   :  { %3818 = dma.done.wait [#allocation4], 512  }
0x1618   :  { %3819 = vsyncadd [#allocation4], 4294966784 }
0x1619   :  { %3820 = dma.done.wait [#allocation13], 16  }
0x161a   :  { %3821 = vsyncadd [#allocation13], 4294967280 }
0x161b   :  { %2868 = vsyncpa [#allocation3], 1 }
0x161c   :  { %2869 = vsyncpa [#allocation6], 1 }
0x161d   :  { %2870 = vsyncpa [#allocation9], 1 }
0x161e   :  { %2871 = vsyncpa [#allocation4], 1 }
0x161f   :  { %2872 = vsyncpa [#allocation13], 1 }

</bundles_post_ra>
